<compile_context>
chip_gen: v7x
topology: tpu7x:2x2x1
jax: 0.10.0
libtpu: 0.0.40
codegen_flags: <defaults>
</compile_context>

<pallas_src>
import functools
import math

import jax
import jax.numpy as jnp
from jax import lax
from jax.experimental import pallas as pl
from jax.experimental.pallas import tpu as pltpu  # noqa: F401  (TPU backend)


def _layer_norm(x, gamma, beta, eps=1e-5):
    mu = jnp.mean(x, axis=-1, keepdims=True)
    var = jnp.mean((x - mu) ** 2, axis=-1, keepdims=True)
    return (x - mu) * lax.rsqrt(var + eps) * gamma + beta


# ---------------------------------------------------------------------------
# Fused MAB kernel: whole batch in one invocation, everything in VMEM.
# ---------------------------------------------------------------------------
def mab_kernel(x_ref, y_ref,
               wq_ref, wkv_ref, wo_ref,
               wr1_ref, wr2_ref, wr3_ref,
               bkv_ref, vec_ref,
               o_ref,
               *, num_heads, b, n, m):
    d = x_ref.shape[-1]
    p = d // num_heads
    inv_temp = 1.0 / math.sqrt(p)

    x = x_ref[...]                      # [b*n, d]
    y = y_ref[...]                      # [b*m, d]
    wo = wo_ref[...]                    # [d, d]
    vec = vec_ref[...]                  # [9, d] packed vector params
    bq, bo = vec[0], vec[1]
    g1, be1 = vec[2], vec[3]
    br1, br2, br3 = vec[4], vec[5], vec[6]
    g2, be2 = vec[7], vec[8]

    # Fused projections over the whole (batch*rows) axis.
    q = jnp.dot(x, wq_ref[...], preferred_element_type=jnp.float32) + bq            # [b*n, d]
    kv = jnp.dot(y, wkv_ref[...], preferred_element_type=jnp.float32) + bkv_ref[0, :]  # [b*m, 2d]
    k = kv[:, :d]
    v = kv[:, d:]

    # Per-batch, per-head attention.  Head outputs are folded directly into the
    # output projection via static row-slices of wo (no concatenate, no .T).
    mh_rows = []
    for bi in range(b):
        qb = q[bi * n:(bi + 1) * n, :]
        kb = k[bi * m:(bi + 1) * m, :]
        vb = v[bi * m:(bi + 1) * m, :]
        mh_b = None
        for hi in range(num_heads):
            qh = qb[:, hi * p:(hi + 1) * p]
            kh = kb[:, hi * p:(hi + 1) * p]
            vh = vb[:, hi * p:(hi + 1) * p]
            s = lax.dot_general(qh, kh, (((1,), (1,)), ((), ())),
                                preferred_element_type=jnp.float32) * inv_temp       # [n, m]
            s = s - jnp.max(s, axis=-1, keepdims=True)
            e = jnp.exp(s)
            attn = e * pl.reciprocal(jnp.sum(e, axis=-1, keepdims=True), approx=True)
            oh = jnp.dot(attn, vh, preferred_element_type=jnp.float32)               # [n, p]
            contrib = jnp.dot(oh, wo[hi * p:(hi + 1) * p, :],
                              preferred_element_type=jnp.float32)                    # [n, d]
            mh_b = contrib if mh_b is None else mh_b + contrib
        mh_rows.append(mh_b)
    mh = jnp.concatenate(mh_rows, axis=0) + bo                                       # [b*n, d]

    # Residual + LayerNorm 1.
    h1 = _layer_norm(x + mh, g1, be1)

    # Row-wise feed-forward: 3 x (Linear + ReLU) over all b*n rows at once.
    t = jnp.maximum(jnp.dot(h1, wr1_ref[...], preferred_element_type=jnp.float32) + br1, 0.0)
    t = jnp.maximum(jnp.dot(t, wr2_ref[...], preferred_element_type=jnp.float32) + br2, 0.0)
    t = jnp.maximum(jnp.dot(t, wr3_ref[...], preferred_element_type=jnp.float32) + br3, 0.0)

    # Residual + LayerNorm 2.
    o_ref[...] = _layer_norm(h1 + t, g2, be2).astype(o_ref.dtype)


def mab_forward(x, y, params, num_heads):
    b, n, d = x.shape
    _, m, _ = y.shape
    kernel = functools.partial(mab_kernel, num_heads=num_heads, b=b, n=n, m=m)
    out2 = pl.pallas_call(
        kernel,
        out_shape=jax.ShapeDtypeStruct((b * n, d), x.dtype),
    )(
        x.reshape(b * n, d), y.reshape(b * m, d),
        params["wq"], params["wkv"], params["wo"],
        params["wr1"], params["wr2"], params["wr3"],
        params["bkv"], params["vecs"],
    )
    return out2.reshape(b, n, d)


# ---------------------------------------------------------------------------
# Final predictor Linear(k*d -> 128): lane-dense (128-wide) output.
# ---------------------------------------------------------------------------
def predictor_kernel(x_ref, w_ref, b_ref, o_ref):
    o_ref[...] = (jnp.dot(x_ref[...], w_ref[...], preferred_element_type=jnp.float32)
                  + b_ref[0, :]).astype(o_ref.dtype)


def predictor_forward(x, w, bvec):
    return pl.pallas_call(
        predictor_kernel,
        out_shape=jax.ShapeDtypeStruct((x.shape[0], w.shape[1]), x.dtype),
    )(x, w, bvec.reshape(1, -1))


# ---------------------------------------------------------------------------
# Parameters
# ---------------------------------------------------------------------------
def _mk(key, shape, scale=0.1):
    return (scale * jax.random.normal(key, shape)).astype(jnp.float32)


def init_mab_params(key, d):
    ks = jax.random.split(key, 18)
    wq, bq = _mk(ks[0], (d, d)), _mk(ks[1], (d,))
    wk, bk = _mk(ks[2], (d, d)), _mk(ks[3], (d,))
    wv, bv = _mk(ks[4], (d, d)), _mk(ks[5], (d,))
    wo, bo = _mk(ks[6], (d, d)), _mk(ks[7], (d,))
    g1 = 1.0 + _mk(ks[8], (d,), 0.01)
    be1 = _mk(ks[9], (d,), 0.01)
    wr1, br1 = _mk(ks[10], (d, d)), _mk(ks[11], (d,))
    wr2, br2 = _mk(ks[12], (d, d)), _mk(ks[13], (d,))
    wr3, br3 = _mk(ks[14], (d, d)), _mk(ks[15], (d,))
    g2 = 1.0 + _mk(ks[16], (d,), 0.01)
    be2 = _mk(ks[17], (d,), 0.01)
    return {
        # fused / packed forms for the Pallas kernel
        "wq": wq, "wkv": jnp.concatenate([wk, wv], axis=1),
        "wo": wo, "wr1": wr1, "wr2": wr2, "wr3": wr3,
        "bkv": jnp.concatenate([bk, bv]).reshape(1, 2 * d),
        "vecs": jnp.stack([bq, bo, g1, be1, br1, br2, br3, g2, be2], axis=0),
        # raw forms for the pure-JAX reference
        "bq": bq, "wk": wk, "bk": bk, "wv": wv, "bv": bv, "bo": bo,
        "g1": g1, "be1": be1, "br1": br1, "br2": br2, "br3": br3,
        "g2": g2, "be2": be2,
    }


def init_set_transformer_params(key, d=46, m_ind=16, k_seeds=2, out_dim=128):
    ks = jax.random.split(key, 11)
    return {
        "isab1": {"ind": jax.random.normal(ks[0], (1, m_ind, d), jnp.float32),
                  "mab1": init_mab_params(ks[1], d),
                  "mab2": init_mab_params(ks[2], d)},
        "isab2": {"ind": jax.random.normal(ks[3], (1, m_ind, d), jnp.float32),
                  "mab1": init_mab_params(ks[4], d),
                  "mab2": init_mab_params(ks[5], d)},
        "pma": {"seeds": jax.random.normal(ks[6], (1, k_seeds, d), jnp.float32),
                "mab": init_mab_params(ks[7], d)},
        "sab": {"mab": init_mab_params(ks[8], d)},
        "pred_w": _mk(ks[9], (k_seeds * d, out_dim)),
        "pred_b": _mk(ks[10], (out_dim,)),
    }


# ---------------------------------------------------------------------------
# Full SetTransformer forward (parametrized by MAB / Linear implementations so
# the same code drives both the Pallas path and the pure-JAX reference).
# Note: decoder_2 / decoder_3 in the PyTorch module are never used in forward.
# ---------------------------------------------------------------------------
def isab_forward(x, p, num_heads, mab_fn):
    b = x.shape[0]
    ind = jnp.broadcast_to(p["ind"], (b,) + p["ind"].shape[1:])
    hz = mab_fn(ind, x, p["mab1"], num_heads)
    return mab_fn(x, hz, p["mab2"], num_heads)


def set_transformer_forward(x, params, num_heads, mab_fn, linear_fn):
    z = isab_forward(x, params["isab1"], num_heads, mab_fn)
    z = isab_forward(z, params["isab2"], num_heads, mab_fn)
    b = z.shape[0]
    seeds = jnp.broadcast_to(params["pma"]["seeds"],
                             (b,) + params["pma"]["seeds"].shape[1:])
    z = mab_fn(seeds, z, params["pma"]["mab"], num_heads)   # PMA -> [b, k, d]
    z = mab_fn(z, z, params["sab"]["mab"], num_heads)       # SAB -> [b, k, d]
    zf = z.reshape(b, -1)                                   # [b, k*d]
    return linear_fn(zf, params["pred_w"], params["pred_b"])


# ---------------------------------------------------------------------------
# Pure-JAX reference (mirrors PyTorch semantics exactly)
# ---------------------------------------------------------------------------
def mab_reference(x, y, params, num_heads):
    b, n, d = x.shape
    _, m, _ = y.shape
    p = d // num_heads

    q = x @ params["wq"] + params["bq"]
    k = y @ params["wk"] + params["bk"]
    v = y @ params["wv"] + params["bv"]

    def split(t, s):
        t = t.reshape(b, s, num_heads, p).transpose(2, 0, 1, 3)
        return t.reshape(num_heads * b, s, p)

    qh, kh, vh = split(q, n), split(k, m), split(v, m)
    scores = jnp.einsum("bnp,bmp->bnm", qh, kh) / math.sqrt(p)
    attn = jax.nn.softmax(scores, axis=2)
    o = jnp.einsum("bnm,bmp->bnp", attn, vh)
    o = o.reshape(num_heads, b, n, p).transpose(1, 2, 0, 3).reshape(b, n, d)
    mh = o @ params["wo"] + params["bo"]

    h1 = _layer_norm(x + mh, params["g1"], params["be1"])
    t = jnp.maximum(h1 @ params["wr1"] + params["br1"], 0.0)
    t = jnp.maximum(t @ params["wr2"] + params["br2"], 0.0)
    t = jnp.maximum(t @ params["wr3"] + params["br3"], 0.0)
    return _layer_norm(h1 + t, params["g2"], params["be2"])


def linear_reference(x, w, bvec):
    return x @ w + bvec


if __name__ == "__main__":
    # SetTransformer config from the module: d=46, h=2, m=16 inducing, k=2 seeds.
    d, m_ind, heads, k_seeds, out_dim = 46, 16, 2, 2, 128
    b, n = 2, 8

    key = jax.random.PRNGKey(0)
    kp, kx = jax.random.split(key)
    params = init_set_transformer_params(kp, d=d, m_ind=m_ind,
                                         k_seeds=k_seeds, out_dim=out_dim)
    x = jax.random.normal(kx, (b, n, d), dtype=jnp.float32)

    out = set_transformer_forward(x, params, heads, mab_forward, predictor_forward)
    out = jax.block_until_ready(out)
    assert out.shape == (b, out_dim)

    ref = set_transformer_forward(x, params, heads, mab_reference, linear_reference)
    ref = jax.block_until_ready(ref)
    # Tolerance covers the EUP approximate-reciprocal softmax across 6 MABs.
    assert jnp.allclose(out, ref, atol=2e-2, rtol=2e-2), "mismatch vs reference"

    print("KERNEL_OK")
</pallas_src>

<mosaic_0001>
module attributes {stable_mosaic.version = 11 : i64} {
  func.func @mab_kernel(%arg0: memref<32x46xf32, #tpu.memory_space<vmem>>, %arg1: memref<16x46xf32, #tpu.memory_space<vmem>>, %arg2: memref<46x46xf32, #tpu.memory_space<vmem>>, %arg3: memref<46x92xf32, #tpu.memory_space<vmem>>, %arg4: memref<46x46xf32, #tpu.memory_space<vmem>>, %arg5: memref<46x46xf32, #tpu.memory_space<vmem>>, %arg6: memref<46x46xf32, #tpu.memory_space<vmem>>, %arg7: memref<46x46xf32, #tpu.memory_space<vmem>>, %arg8: memref<1x92xf32, #tpu.memory_space<vmem>>, %arg9: memref<9x46xf32, #tpu.memory_space<vmem>>, %arg10: memref<32x46xf32, #tpu.memory_space<vmem>>) attributes {dimension_semantics = [], scalar_prefetch = 0 : i64, scratch_operands = 0 : i64, tpu.core_type = #tpu.core_type<tc>} {
    %c0 = arith.constant 0 : index
    %c0_0 = arith.constant 0 : index
    %0 = vector.load %arg0[%c0, %c0_0] : memref<32x46xf32, #tpu.memory_space<vmem>>, vector<32x46xf32>
    %c0_1 = arith.constant 0 : index
    %c0_2 = arith.constant 0 : index
    %1 = vector.load %arg1[%c0_1, %c0_2] : memref<16x46xf32, #tpu.memory_space<vmem>>, vector<16x46xf32>
    %c0_3 = arith.constant 0 : index
    %c0_4 = arith.constant 0 : index
    %2 = vector.load %arg4[%c0_3, %c0_4] : memref<46x46xf32, #tpu.memory_space<vmem>>, vector<46x46xf32>
    %c0_5 = arith.constant 0 : index
    %c0_6 = arith.constant 0 : index
    %3 = vector.load %arg9[%c0_5, %c0_6] : memref<9x46xf32, #tpu.memory_space<vmem>>, vector<9x46xf32>
    %4 = vector.extract_strided_slice %3 {offsets = [0, 0], sizes = [1, 46], strides = [1, 1]} : vector<9x46xf32> to vector<1x46xf32>
    %5 = vector.shape_cast %4 : vector<1x46xf32> to vector<46xf32>
    %6 = vector.extract_strided_slice %3 {offsets = [1, 0], sizes = [1, 46], strides = [1, 1]} : vector<9x46xf32> to vector<1x46xf32>
    %7 = vector.shape_cast %6 : vector<1x46xf32> to vector<46xf32>
    %8 = vector.extract_strided_slice %3 {offsets = [2, 0], sizes = [1, 46], strides = [1, 1]} : vector<9x46xf32> to vector<1x46xf32>
    %9 = vector.shape_cast %8 : vector<1x46xf32> to vector<46xf32>
    %10 = vector.extract_strided_slice %3 {offsets = [3, 0], sizes = [1, 46], strides = [1, 1]} : vector<9x46xf32> to vector<1x46xf32>
    %11 = vector.shape_cast %10 : vector<1x46xf32> to vector<46xf32>
    %12 = vector.extract_strided_slice %3 {offsets = [4, 0], sizes = [1, 46], strides = [1, 1]} : vector<9x46xf32> to vector<1x46xf32>
    %13 = vector.shape_cast %12 : vector<1x46xf32> to vector<46xf32>
    %14 = vector.extract_strided_slice %3 {offsets = [5, 0], sizes = [1, 46], strides = [1, 1]} : vector<9x46xf32> to vector<1x46xf32>
    %15 = vector.shape_cast %14 : vector<1x46xf32> to vector<46xf32>
    %16 = vector.extract_strided_slice %3 {offsets = [6, 0], sizes = [1, 46], strides = [1, 1]} : vector<9x46xf32> to vector<1x46xf32>
    %17 = vector.shape_cast %16 : vector<1x46xf32> to vector<46xf32>
    %18 = vector.extract_strided_slice %3 {offsets = [7, 0], sizes = [1, 46], strides = [1, 1]} : vector<9x46xf32> to vector<1x46xf32>
    %19 = vector.shape_cast %18 : vector<1x46xf32> to vector<46xf32>
    %20 = vector.extract_strided_slice %3 {offsets = [8, 0], sizes = [1, 46], strides = [1, 1]} : vector<9x46xf32> to vector<1x46xf32>
    %21 = vector.shape_cast %20 : vector<1x46xf32> to vector<46xf32>
    %c0_7 = arith.constant 0 : index
    %c0_8 = arith.constant 0 : index
    %22 = vector.load %arg2[%c0_7, %c0_8] : memref<46x46xf32, #tpu.memory_space<vmem>>, vector<46x46xf32>
    %cst = arith.constant dense<0.000000e+00> : vector<32x46xf32>
    %23 = tpu.matmul %0, %22, %cst {dimension_numbers = #tpu.dot_dimension_numbers<[1], [0], [0], [1], [0, 0, 1, 1], [], []>} : vector<32x46xf32>, vector<46x46xf32>, vector<32x46xf32> -> vector<32x46xf32>
    %24 = vector.shape_cast %5 : vector<46xf32> to vector<1x46xf32>
    %25 = vector.broadcast %24 : vector<1x46xf32> to vector<32x46xf32>
    %26 = arith.addf %23, %25 : vector<32x46xf32>
    %c0_9 = arith.constant 0 : index
    %c0_10 = arith.constant 0 : index
    %27 = vector.load %arg3[%c0_9, %c0_10] : memref<46x92xf32, #tpu.memory_space<vmem>>, vector<46x92xf32>
    %cst_11 = arith.constant dense<0.000000e+00> : vector<16x92xf32>
    %28 = tpu.matmul %1, %27, %cst_11 {dimension_numbers = #tpu.dot_dimension_numbers<[1], [0], [0], [1], [0, 0, 1, 1], [], []>} : vector<16x46xf32>, vector<46x92xf32>, vector<16x92xf32> -> vector<16x92xf32>
    %c0_12 = arith.constant 0 : index
    %c0_13 = arith.constant 0 : index
    %29 = vector.load %arg8[%c0_12, %c0_13] : memref<1x92xf32, #tpu.memory_space<vmem>>, vector<1x92xf32>
    %30 = vector.shape_cast %29 : vector<1x92xf32> to vector<92xf32>
    %31 = vector.shape_cast %30 : vector<92xf32> to vector<1x92xf32>
    %32 = vector.broadcast %31 : vector<1x92xf32> to vector<16x92xf32>
    %33 = arith.addf %28, %32 : vector<16x92xf32>
    %34 = vector.extract_strided_slice %33 {offsets = [0, 0], sizes = [16, 46], strides = [1, 1]} : vector<16x92xf32> to vector<16x46xf32>
    %35 = vector.extract_strided_slice %33 {offsets = [0, 46], sizes = [16, 46], strides = [1, 1]} : vector<16x92xf32> to vector<16x46xf32>
    %36 = vector.extract_strided_slice %26 {offsets = [0, 0], sizes = [16, 46], strides = [1, 1]} : vector<32x46xf32> to vector<16x46xf32>
    %37 = vector.extract_strided_slice %34 {offsets = [0, 0], sizes = [8, 46], strides = [1, 1]} : vector<16x46xf32> to vector<8x46xf32>
    %38 = vector.extract_strided_slice %35 {offsets = [0, 0], sizes = [8, 46], strides = [1, 1]} : vector<16x46xf32> to vector<8x46xf32>
    %39 = vector.extract_strided_slice %36 {offsets = [0, 0], sizes = [16, 23], strides = [1, 1]} : vector<16x46xf32> to vector<16x23xf32>
    %40 = vector.extract_strided_slice %37 {offsets = [0, 0], sizes = [8, 23], strides = [1, 1]} : vector<8x46xf32> to vector<8x23xf32>
    %41 = vector.extract_strided_slice %38 {offsets = [0, 0], sizes = [8, 23], strides = [1, 1]} : vector<8x46xf32> to vector<8x23xf32>
    %cst_14 = arith.constant dense<0.000000e+00> : vector<16x8xf32>
    %42 = tpu.matmul %39, %40, %cst_14 {dimension_numbers = #tpu.dot_dimension_numbers<[1], [1], [0], [0], [0, 0, 1, 0], [], []>} : vector<16x23xf32>, vector<8x23xf32>, vector<16x8xf32> -> vector<16x8xf32>
    %cst_15 = arith.constant 0.208514407 : f32
    %43 = vector.broadcast %cst_15 : f32 to vector<16x8xf32>
    %44 = arith.mulf %42, %43 : vector<16x8xf32>
    %cst_16 = arith.constant dense<0xFF800000> : vector<16xf32>
    %45 = vector.multi_reduction <maximumf>, %44, %cst_16 [1] : vector<16x8xf32> to vector<16xf32>
    %46 = vector.shape_cast %45 : vector<16xf32> to vector<16x1xf32>
    %47 = vector.broadcast %46 : vector<16x1xf32> to vector<16x8xf32>
    %48 = arith.subf %44, %47 : vector<16x8xf32>
    %49 = math.exp %48 : vector<16x8xf32>
    %cst_17 = arith.constant dense<0.000000e+00> : vector<16xf32>
    %50 = vector.multi_reduction <add>, %49, %cst_17 [1] : vector<16x8xf32> to vector<16xf32>
    %51 = vector.shape_cast %50 : vector<16xf32> to vector<16x1xf32>
    %52 = tpu.reciprocal %51 {approx = true} : vector<16x1xf32> -> vector<16x1xf32>
    %53 = vector.broadcast %52 : vector<16x1xf32> to vector<16x8xf32>
    %54 = arith.mulf %49, %53 : vector<16x8xf32>
    %cst_18 = arith.constant dense<0.000000e+00> : vector<16x23xf32>
    %55 = tpu.matmul %54, %41, %cst_18 {dimension_numbers = #tpu.dot_dimension_numbers<[1], [0], [0], [1], [0, 0, 1, 1], [], []>} : vector<16x8xf32>, vector<8x23xf32>, vector<16x23xf32> -> vector<16x23xf32>
    %56 = vector.extract_strided_slice %2 {offsets = [0, 0], sizes = [23, 46], strides = [1, 1]} : vector<46x46xf32> to vector<23x46xf32>
    %cst_19 = arith.constant dense<0.000000e+00> : vector<16x46xf32>
    %57 = tpu.matmul %55, %56, %cst_19 {dimension_numbers = #tpu.dot_dimension_numbers<[1], [0], [0], [1], [0, 0, 1, 1], [], []>} : vector<16x23xf32>, vector<23x46xf32>, vector<16x46xf32> -> vector<16x46xf32>
    %58 = vector.extract_strided_slice %36 {offsets = [0, 23], sizes = [16, 23], strides = [1, 1]} : vector<16x46xf32> to vector<16x23xf32>
    %59 = vector.extract_strided_slice %37 {offsets = [0, 23], sizes = [8, 23], strides = [1, 1]} : vector<8x46xf32> to vector<8x23xf32>
    %60 = vector.extract_strided_slice %38 {offsets = [0, 23], sizes = [8, 23], strides = [1, 1]} : vector<8x46xf32> to vector<8x23xf32>
    %cst_20 = arith.constant dense<0.000000e+00> : vector<16x8xf32>
    %61 = tpu.matmul %58, %59, %cst_20 {dimension_numbers = #tpu.dot_dimension_numbers<[1], [1], [0], [0], [0, 0, 1, 0], [], []>} : vector<16x23xf32>, vector<8x23xf32>, vector<16x8xf32> -> vector<16x8xf32>
    %cst_21 = arith.constant 0.208514407 : f32
    %62 = vector.broadcast %cst_21 : f32 to vector<16x8xf32>
    %63 = arith.mulf %61, %62 : vector<16x8xf32>
    %cst_22 = arith.constant dense<0xFF800000> : vector<16xf32>
    %64 = vector.multi_reduction <maximumf>, %63, %cst_22 [1] : vector<16x8xf32> to vector<16xf32>
    %65 = vector.shape_cast %64 : vector<16xf32> to vector<16x1xf32>
    %66 = vector.broadcast %65 : vector<16x1xf32> to vector<16x8xf32>
    %67 = arith.subf %63, %66 : vector<16x8xf32>
    %68 = math.exp %67 : vector<16x8xf32>
    %cst_23 = arith.constant dense<0.000000e+00> : vector<16xf32>
    %69 = vector.multi_reduction <add>, %68, %cst_23 [1] : vector<16x8xf32> to vector<16xf32>
    %70 = vector.shape_cast %69 : vector<16xf32> to vector<16x1xf32>
    %71 = tpu.reciprocal %70 {approx = true} : vector<16x1xf32> -> vector<16x1xf32>
    %72 = vector.broadcast %71 : vector<16x1xf32> to vector<16x8xf32>
    %73 = arith.mulf %68, %72 : vector<16x8xf32>
    %cst_24 = arith.constant dense<0.000000e+00> : vector<16x23xf32>
    %74 = tpu.matmul %73, %60, %cst_24 {dimension_numbers = #tpu.dot_dimension_numbers<[1], [0], [0], [1], [0, 0, 1, 1], [], []>} : vector<16x8xf32>, vector<8x23xf32>, vector<16x23xf32> -> vector<16x23xf32>
    %75 = vector.extract_strided_slice %2 {offsets = [23, 0], sizes = [23, 46], strides = [1, 1]} : vector<46x46xf32> to vector<23x46xf32>
    %cst_25 = arith.constant dense<0.000000e+00> : vector<16x46xf32>
    %76 = tpu.matmul %74, %75, %cst_25 {dimension_numbers = #tpu.dot_dimension_numbers<[1], [0], [0], [1], [0, 0, 1, 1], [], []>} : vector<16x23xf32>, vector<23x46xf32>, vector<16x46xf32> -> vector<16x46xf32>
    %77 = arith.addf %57, %76 : vector<16x46xf32>
    %78 = vector.extract_strided_slice %26 {offsets = [16, 0], sizes = [16, 46], strides = [1, 1]} : vector<32x46xf32> to vector<16x46xf32>
    %79 = vector.extract_strided_slice %34 {offsets = [8, 0], sizes = [8, 46], strides = [1, 1]} : vector<16x46xf32> to vector<8x46xf32>
    %80 = vector.extract_strided_slice %35 {offsets = [8, 0], sizes = [8, 46], strides = [1, 1]} : vector<16x46xf32> to vector<8x46xf32>
    %81 = vector.extract_strided_slice %78 {offsets = [0, 0], sizes = [16, 23], strides = [1, 1]} : vector<16x46xf32> to vector<16x23xf32>
    %82 = vector.extract_strided_slice %79 {offsets = [0, 0], sizes = [8, 23], strides = [1, 1]} : vector<8x46xf32> to vector<8x23xf32>
    %83 = vector.extract_strided_slice %80 {offsets = [0, 0], sizes = [8, 23], strides = [1, 1]} : vector<8x46xf32> to vector<8x23xf32>
    %cst_26 = arith.constant dense<0.000000e+00> : vector<16x8xf32>
    %84 = tpu.matmul %81, %82, %cst_26 {dimension_numbers = #tpu.dot_dimension_numbers<[1], [1], [0], [0], [0, 0, 1, 0], [], []>} : vector<16x23xf32>, vector<8x23xf32>, vector<16x8xf32> -> vector<16x8xf32>
    %cst_27 = arith.constant 0.208514407 : f32
    %85 = vector.broadcast %cst_27 : f32 to vector<16x8xf32>
    %86 = arith.mulf %84, %85 : vector<16x8xf32>
    %cst_28 = arith.constant dense<0xFF800000> : vector<16xf32>
    %87 = vector.multi_reduction <maximumf>, %86, %cst_28 [1] : vector<16x8xf32> to vector<16xf32>
    %88 = vector.shape_cast %87 : vector<16xf32> to vector<16x1xf32>
    %89 = vector.broadcast %88 : vector<16x1xf32> to vector<16x8xf32>
    %90 = arith.subf %86, %89 : vector<16x8xf32>
    %91 = math.exp %90 : vector<16x8xf32>
    %cst_29 = arith.constant dense<0.000000e+00> : vector<16xf32>
    %92 = vector.multi_reduction <add>, %91, %cst_29 [1] : vector<16x8xf32> to vector<16xf32>
    %93 = vector.shape_cast %92 : vector<16xf32> to vector<16x1xf32>
    %94 = tpu.reciprocal %93 {approx = true} : vector<16x1xf32> -> vector<16x1xf32>
    %95 = vector.broadcast %94 : vector<16x1xf32> to vector<16x8xf32>
    %96 = arith.mulf %91, %95 : vector<16x8xf32>
    %cst_30 = arith.constant dense<0.000000e+00> : vector<16x23xf32>
    %97 = tpu.matmul %96, %83, %cst_30 {dimension_numbers = #tpu.dot_dimension_numbers<[1], [0], [0], [1], [0, 0, 1, 1], [], []>} : vector<16x8xf32>, vector<8x23xf32>, vector<16x23xf32> -> vector<16x23xf32>
    %98 = vector.extract_strided_slice %2 {offsets = [0, 0], sizes = [23, 46], strides = [1, 1]} : vector<46x46xf32> to vector<23x46xf32>
    %cst_31 = arith.constant dense<0.000000e+00> : vector<16x46xf32>
    %99 = tpu.matmul %97, %98, %cst_31 {dimension_numbers = #tpu.dot_dimension_numbers<[1], [0], [0], [1], [0, 0, 1, 1], [], []>} : vector<16x23xf32>, vector<23x46xf32>, vector<16x46xf32> -> vector<16x46xf32>
    %100 = vector.extract_strided_slice %78 {offsets = [0, 23], sizes = [16, 23], strides = [1, 1]} : vector<16x46xf32> to vector<16x23xf32>
    %101 = vector.extract_strided_slice %79 {offsets = [0, 23], sizes = [8, 23], strides = [1, 1]} : vector<8x46xf32> to vector<8x23xf32>
    %102 = vector.extract_strided_slice %80 {offsets = [0, 23], sizes = [8, 23], strides = [1, 1]} : vector<8x46xf32> to vector<8x23xf32>
    %cst_32 = arith.constant dense<0.000000e+00> : vector<16x8xf32>
    %103 = tpu.matmul %100, %101, %cst_32 {dimension_numbers = #tpu.dot_dimension_numbers<[1], [1], [0], [0], [0, 0, 1, 0], [], []>} : vector<16x23xf32>, vector<8x23xf32>, vector<16x8xf32> -> vector<16x8xf32>
    %cst_33 = arith.constant 0.208514407 : f32
    %104 = vector.broadcast %cst_33 : f32 to vector<16x8xf32>
    %105 = arith.mulf %103, %104 : vector<16x8xf32>
    %cst_34 = arith.constant dense<0xFF800000> : vector<16xf32>
    %106 = vector.multi_reduction <maximumf>, %105, %cst_34 [1] : vector<16x8xf32> to vector<16xf32>
    %107 = vector.shape_cast %106 : vector<16xf32> to vector<16x1xf32>
    %108 = vector.broadcast %107 : vector<16x1xf32> to vector<16x8xf32>
    %109 = arith.subf %105, %108 : vector<16x8xf32>
    %110 = math.exp %109 : vector<16x8xf32>
    %cst_35 = arith.constant dense<0.000000e+00> : vector<16xf32>
    %111 = vector.multi_reduction <add>, %110, %cst_35 [1] : vector<16x8xf32> to vector<16xf32>
    %112 = vector.shape_cast %111 : vector<16xf32> to vector<16x1xf32>
    %113 = tpu.reciprocal %112 {approx = true} : vector<16x1xf32> -> vector<16x1xf32>
    %114 = vector.broadcast %113 : vector<16x1xf32> to vector<16x8xf32>
    %115 = arith.mulf %110, %114 : vector<16x8xf32>
    %cst_36 = arith.constant dense<0.000000e+00> : vector<16x23xf32>
    %116 = tpu.matmul %115, %102, %cst_36 {dimension_numbers = #tpu.dot_dimension_numbers<[1], [0], [0], [1], [0, 0, 1, 1], [], []>} : vector<16x8xf32>, vector<8x23xf32>, vector<16x23xf32> -> vector<16x23xf32>
    %117 = vector.extract_strided_slice %2 {offsets = [23, 0], sizes = [23, 46], strides = [1, 1]} : vector<46x46xf32> to vector<23x46xf32>
    %cst_37 = arith.constant dense<0.000000e+00> : vector<16x46xf32>
    %118 = tpu.matmul %116, %117, %cst_37 {dimension_numbers = #tpu.dot_dimension_numbers<[1], [0], [0], [1], [0, 0, 1, 1], [], []>} : vector<16x23xf32>, vector<23x46xf32>, vector<16x46xf32> -> vector<16x46xf32>
    %119 = arith.addf %99, %118 : vector<16x46xf32>
    %120 = tpu.concatenate %77, %119 in 0 : vector<16x46xf32>, vector<16x46xf32> -> vector<32x46xf32>
    %121 = vector.shape_cast %7 : vector<46xf32> to vector<1x46xf32>
    %122 = vector.broadcast %121 : vector<1x46xf32> to vector<32x46xf32>
    %123 = arith.addf %120, %122 : vector<32x46xf32>
    %124 = arith.addf %0, %123 : vector<32x46xf32>
    %cst_38 = arith.constant dense<0.000000e+00> : vector<32xf32>
    %125 = vector.multi_reduction <add>, %124, %cst_38 [1] : vector<32x46xf32> to vector<32xf32>
    %126 = vector.shape_cast %125 : vector<32xf32> to vector<32x1xf32>
    %cst_39 = arith.constant 4.600000e+01 : f32
    %127 = vector.broadcast %cst_39 : f32 to vector<32x1xf32>
    %128 = arith.divf %126, %127 : vector<32x1xf32>
    %129 = vector.broadcast %128 : vector<32x1xf32> to vector<32x46xf32>
    %130 = arith.subf %124, %129 : vector<32x46xf32>
    %131 = arith.mulf %130, %130 : vector<32x46xf32>
    %cst_40 = arith.constant dense<0.000000e+00> : vector<32xf32>
    %132 = vector.multi_reduction <add>, %131, %cst_40 [1] : vector<32x46xf32> to vector<32xf32>
    %133 = vector.shape_cast %132 : vector<32xf32> to vector<32x1xf32>
    %cst_41 = arith.constant 4.600000e+01 : f32
    %134 = vector.broadcast %cst_41 : f32 to vector<32x1xf32>
    %135 = arith.divf %133, %134 : vector<32x1xf32>
    %136 = vector.broadcast %128 : vector<32x1xf32> to vector<32x46xf32>
    %137 = arith.subf %124, %136 : vector<32x46xf32>
    %cst_42 = arith.constant 9.99999974E-6 : f32
    %138 = vector.broadcast %cst_42 : f32 to vector<32x1xf32>
    %139 = arith.addf %135, %138 : vector<32x1xf32>
    %140 = math.rsqrt %139 : vector<32x1xf32>
    %141 = vector.broadcast %140 : vector<32x1xf32> to vector<32x46xf32>
    %142 = arith.mulf %137, %141 : vector<32x46xf32>
    %143 = vector.shape_cast %9 : vector<46xf32> to vector<1x46xf32>
    %144 = vector.broadcast %143 : vector<1x46xf32> to vector<32x46xf32>
    %145 = arith.mulf %142, %144 : vector<32x46xf32>
    %146 = vector.shape_cast %11 : vector<46xf32> to vector<1x46xf32>
    %147 = vector.broadcast %146 : vector<1x46xf32> to vector<32x46xf32>
    %148 = arith.addf %145, %147 : vector<32x46xf32>
    %c0_43 = arith.constant 0 : index
    %c0_44 = arith.constant 0 : index
    %149 = vector.load %arg5[%c0_43, %c0_44] : memref<46x46xf32, #tpu.memory_space<vmem>>, vector<46x46xf32>
    %cst_45 = arith.constant dense<0.000000e+00> : vector<32x46xf32>
    %150 = tpu.matmul %148, %149, %cst_45 {dimension_numbers = #tpu.dot_dimension_numbers<[1], [0], [0], [1], [0, 0, 1, 1], [], []>} : vector<32x46xf32>, vector<46x46xf32>, vector<32x46xf32> -> vector<32x46xf32>
    %151 = vector.shape_cast %13 : vector<46xf32> to vector<1x46xf32>
    %152 = vector.broadcast %151 : vector<1x46xf32> to vector<32x46xf32>
    %153 = arith.addf %150, %152 : vector<32x46xf32>
    %cst_46 = arith.constant 0.000000e+00 : f32
    %154 = vector.broadcast %cst_46 : f32 to vector<32x46xf32>
    %155 = arith.maximumf %153, %154 : vector<32x46xf32>
    %c0_47 = arith.constant 0 : index
    %c0_48 = arith.constant 0 : index
    %156 = vector.load %arg6[%c0_47, %c0_48] : memref<46x46xf32, #tpu.memory_space<vmem>>, vector<46x46xf32>
    %cst_49 = arith.constant dense<0.000000e+00> : vector<32x46xf32>
    %157 = tpu.matmul %155, %156, %cst_49 {dimension_numbers = #tpu.dot_dimension_numbers<[1], [0], [0], [1], [0, 0, 1, 1], [], []>} : vector<32x46xf32>, vector<46x46xf32>, vector<32x46xf32> -> vector<32x46xf32>
    %158 = vector.shape_cast %15 : vector<46xf32> to vector<1x46xf32>
    %159 = vector.broadcast %158 : vector<1x46xf32> to vector<32x46xf32>
    %160 = arith.addf %157, %159 : vector<32x46xf32>
    %cst_50 = arith.constant 0.000000e+00 : f32
    %161 = vector.broadcast %cst_50 : f32 to vector<32x46xf32>
    %162 = arith.maximumf %160, %161 : vector<32x46xf32>
    %c0_51 = arith.constant 0 : index
    %c0_52 = arith.constant 0 : index
    %163 = vector.load %arg7[%c0_51, %c0_52] : memref<46x46xf32, #tpu.memory_space<vmem>>, vector<46x46xf32>
    %cst_53 = arith.constant dense<0.000000e+00> : vector<32x46xf32>
    %164 = tpu.matmul %162, %163, %cst_53 {dimension_numbers = #tpu.dot_dimension_numbers<[1], [0], [0], [1], [0, 0, 1, 1], [], []>} : vector<32x46xf32>, vector<46x46xf32>, vector<32x46xf32> -> vector<32x46xf32>
    %165 = vector.shape_cast %17 : vector<46xf32> to vector<1x46xf32>
    %166 = vector.broadcast %165 : vector<1x46xf32> to vector<32x46xf32>
    %167 = arith.addf %164, %166 : vector<32x46xf32>
    %cst_54 = arith.constant 0.000000e+00 : f32
    %168 = vector.broadcast %cst_54 : f32 to vector<32x46xf32>
    %169 = arith.maximumf %167, %168 : vector<32x46xf32>
    %170 = arith.addf %148, %169 : vector<32x46xf32>
    %cst_55 = arith.constant dense<0.000000e+00> : vector<32xf32>
    %171 = vector.multi_reduction <add>, %170, %cst_55 [1] : vector<32x46xf32> to vector<32xf32>
    %172 = vector.shape_cast %171 : vector<32xf32> to vector<32x1xf32>
    %cst_56 = arith.constant 4.600000e+01 : f32
    %173 = vector.broadcast %cst_56 : f32 to vector<32x1xf32>
    %174 = arith.divf %172, %173 : vector<32x1xf32>
    %175 = vector.broadcast %174 : vector<32x1xf32> to vector<32x46xf32>
    %176 = arith.subf %170, %175 : vector<32x46xf32>
    %177 = arith.mulf %176, %176 : vector<32x46xf32>
    %cst_57 = arith.constant dense<0.000000e+00> : vector<32xf32>
    %178 = vector.multi_reduction <add>, %177, %cst_57 [1] : vector<32x46xf32> to vector<32xf32>
    %179 = vector.shape_cast %178 : vector<32xf32> to vector<32x1xf32>
    %cst_58 = arith.constant 4.600000e+01 : f32
    %180 = vector.broadcast %cst_58 : f32 to vector<32x1xf32>
    %181 = arith.divf %179, %180 : vector<32x1xf32>
    %182 = vector.broadcast %174 : vector<32x1xf32> to vector<32x46xf32>
    %183 = arith.subf %170, %182 : vector<32x46xf32>
    %cst_59 = arith.constant 9.99999974E-6 : f32
    %184 = vector.broadcast %cst_59 : f32 to vector<32x1xf32>
    %185 = arith.addf %181, %184 : vector<32x1xf32>
    %186 = math.rsqrt %185 : vector<32x1xf32>
    %187 = vector.broadcast %186 : vector<32x1xf32> to vector<32x46xf32>
    %188 = arith.mulf %183, %187 : vector<32x46xf32>
    %189 = vector.shape_cast %19 : vector<46xf32> to vector<1x46xf32>
    %190 = vector.broadcast %189 : vector<1x46xf32> to vector<32x46xf32>
    %191 = arith.mulf %188, %190 : vector<32x46xf32>
    %192 = vector.shape_cast %21 : vector<46xf32> to vector<1x46xf32>
    %193 = vector.broadcast %192 : vector<1x46xf32> to vector<32x46xf32>
    %194 = arith.addf %191, %193 : vector<32x46xf32>
    %c0_60 = arith.constant 0 : index
    %c0_61 = arith.constant 0 : index
    %195 = vector.load %arg10[%c0_60, %c0_61] : memref<32x46xf32, #tpu.memory_space<vmem>>, vector<32x46xf32>
    tpu.vector_store %arg10[%c0_60, %c0_61], %194 {strides = array<i32>} : memref<32x46xf32, #tpu.memory_space<vmem>>, vector<32x46xf32>,
    return
  }
}

</mosaic_0001>

<bundles_post_ra>
// kernel: tpu_custom_call.1
= control target key start
LH: loop header
LB: loop body
LE: loop exit
PB: predicated region body
PF: predicated region fallthrough
CT: control target
= control target key end

     0   :  { %15 = vsyncpa [#allocation3], 0  ;;  %s3154_s0 = inlined_call_operand.hbm [shape: f32[32,46], index: 0, kind: input, shape index: {}]   ;;  %s3155_s1 = inlined_call_operand.hbm [shape: f32[16,46], index: 1, kind: input, shape index: {}]   ;;  %s3156_s2 = inlined_call_operand.hbm [shape: f32[46,46], index: 2, kind: input, shape index: {}]   ;;  %s3157_s3 = inlined_call_operand.hbm [shape: f32[46,92], index: 3, kind: input, shape index: {}]   ;;  %s3158_s4 = inlined_call_operand.hbm [shape: f32[46,46], index: 4, kind: input, shape index: {}]   ;;  %s3159_s5 = inlined_call_operand.hbm [shape: f32[46,46], index: 5, kind: input, shape index: {}]   ;;  %s3160_s6 = inlined_call_operand.hbm [shape: f32[46,46], index: 6, kind: input, shape index: {}]   ;;  %s3161_s7 = inlined_call_operand.hbm [shape: f32[46,46], index: 7, kind: input, shape index: {}]   ;;  %s3162_s8 = inlined_call_operand.vmem [shape: f32[1,92], index: 8, kind: input, shape index: {}]   ;;  %s3163_s9 = inlined_call_operand.vmem [shape: f32[9,46], index: 9, kind: input, shape index: {}]   ;;  %s3164_s10 = inlined_call_operand.hbm [shape: f32[32,46], index: 10, kind: output, shape index: {}]  }
   0x1   :  { %16 = vsyncpa [#allocation6], 0 }
   0x2   :  { %17 = vsyncpa [#allocation9], 0 }
   0x3   :  { %18 = vsyncpa [#allocation12], 0 }
   0x4   :  { %19 = vsyncpa [#allocation15], 0 }
   0x5   :  { %20 = vsyncpa [#allocation4], 0  ;;  %s2682_s13 = smov [#allocation5]   ;;  %s2683_s15 = smov [#allocation8]  }
   0x6   :  { %s38_s14 = sshll.u32 %s2682_s13, 4  ;;  %s62_s16 = sshll.u32 %s2683_s15, 4  ;;  %s39_s14 = int_to_ptr.vmem [resolvable:$true] %s38_s14  ;;  %s2752_s16 = int_to_ptr.vmem [resolvable:$true] %s62_s16 }
   0x7   :  { %s2472_s19 = scalar_lea.hbm %s3155_s1, 256 }
   0x8   :  { %p2473_p0 = scmp.ne.s32.totalorder %s3155_s1, %s2472_s19  ;;  %p2476_p1 = scmp.lt.u32.totalorder %s2472_s19, %s3155_s1 }
   0xa   :  { %p2478_p2 = pnand %p2476_p1, %p2473_p0 }
   0xc   :  { %2481 = shalt.err (!%p2478_p2)
}
   0xd   :  { %s2482_s24 = scalar_lea.vmem %s39_s14, 256  ;;  %p2487_p4 = scmp.lt.s32.totalorder %s39_s14, %s39_s14 }
   0xe   :  { %p2483_p3 = scmp.ne.s32.totalorder %s39_s14, %s2482_s24  ;;  %p2488_p5 = scmp.lt.s32.totalorder %s2482_s24, %s2482_s24 }
  0x10   :  { %p2489_p6 = por %p2488_p5, %p2487_p4 }
  0x12   :  { %p2490_p7 = pnand %p2489_p6, %p2483_p3 }
  0x14   :  { %2493 = shalt.err (!%p2490_p7)
}
  0x15   :  { %s2684_s25 = smov 128   ;;  %s2685_s26 = smov 8  }
  0x16   :  { %44 = dma.hbm_to_vmem [thread:$0]  %s3155_s1, 256, %s39_s14, [#allocation6], %s2684_s25, %s2684_s25, %s2685_s26  }
  0x17   :  { %s2494_s11 = scalar_lea.hbm %s3157_s3, 768 }
  0x18   :  { %p2495_p8 = scmp.ne.s32.totalorder %s3157_s3, %s2494_s11  ;;  %p2498_p9 = scmp.lt.u32.totalorder %s2494_s11, %s3157_s3 }
  0x1a   :  { %p2500_p10 = pnand %p2498_p9, %p2495_p8 }
  0x1c   :  { %2503 = shalt.err (!%p2500_p10)
}
  0x1d   :  { %s2504_s18 = scalar_lea.vmem %s2752_s16, 768  ;;  %p2509_p12 = scmp.lt.s32.totalorder %s2752_s16, %s2752_s16 }
  0x1e   :  { %p2505_p11 = scmp.ne.s32.totalorder %s2752_s16, %s2504_s18  ;;  %p2510_p13 = scmp.lt.s32.totalorder %s2504_s18, %s2504_s18 }
  0x20   :  { %p2511_p0 = por %p2510_p13, %p2509_p12 }
  0x22   :  { %p2512_p1 = pnand %p2511_p0, %p2505_p11 }
  0x24   :  { %2515 = shalt.err (!%p2512_p1)
}
  0x25   :  { %68 = dma.hbm_to_vmem [thread:$0]  %s3157_s3, 768, %s2752_s16, [#allocation9], %s2684_s25, %s2684_s25, %s2685_s26  }
  0x26   :  { %s2686_s19 = smov [#allocation11]   ;;  %s2687_s21 = smov [#allocation2]  }
  0x27   :  { %s86_s20 = sshll.u32 %s2686_s19, 4  ;;  %s26_s22 = sshll.u32 %s2687_s21, 4  ;;  %s87_s20 = int_to_ptr.vmem [resolvable:$true] %s86_s20  ;;  %s2789_s22 = int_to_ptr.vmem [resolvable:$true] %s26_s22 }
  0x28   :  { %s2516_s27 = scalar_lea.hbm %s3159_s5, 768 }
  0x29   :  { %p2517_p2 = scmp.ne.s32.totalorder %s3159_s5, %s2516_s27  ;;  %p2520_p3 = scmp.lt.u32.totalorder %s2516_s27, %s3159_s5 }
  0x2b   :  { %p2522_p4 = pnand %p2520_p3, %p2517_p2 }
  0x2d   :  { %2525 = shalt.err (!%p2522_p4)
}
  0x2e   :  { %s2526_s3 = scalar_lea.vmem %s87_s20, 768  ;;  %p2531_p6 = scmp.lt.s32.totalorder %s87_s20, %s87_s20 }
  0x2f   :  { %p2527_p5 = scmp.ne.s32.totalorder %s87_s20, %s2526_s3  ;;  %p2532_p7 = scmp.lt.s32.totalorder %s2526_s3, %s2526_s3 }
  0x31   :  { %p2533_p8 = por %p2532_p7, %p2531_p6 }
  0x33   :  { %p2534_p9 = pnand %p2533_p8, %p2527_p5 }
  0x35   :  { %2537 = shalt.err (!%p2534_p9)
}
  0x36   :  { %92 = dma.hbm_to_vmem [thread:$0]  %s3159_s5, 768, %s87_s20, [#allocation12], %s2684_s25, %s2684_s25, %s2685_s26  }
  0x37   :  { %s2538_s17 = scalar_lea.hbm %s3154_s0, 512 }
  0x38   :  { %p2539_p10 = scmp.ne.s32.totalorder %s3154_s0, %s2538_s17  ;;  %p2542_p11 = scmp.lt.u32.totalorder %s2538_s17, %s3154_s0 }
  0x3a   :  { %p2544_p12 = pnand %p2542_p11, %p2539_p10 }
  0x3c   :  { %2547 = shalt.err (!%p2544_p12)
}
  0x3d   :  { %s2548_s21 = scalar_lea.vmem %s2789_s22, 512  ;;  %p2553_p0 = scmp.lt.s32.totalorder %s2789_s22, %s2789_s22 }
  0x3e   :  { %p2549_p13 = scmp.ne.s32.totalorder %s2789_s22, %s2548_s21  ;;  %p2554_p1 = scmp.lt.s32.totalorder %s2548_s21, %s2548_s21 }
  0x40   :  { %p2555_p2 = por %p2554_p1, %p2553_p0 }
  0x42   :  { %p2556_p3 = pnand %p2555_p2, %p2549_p13 }
  0x44   :  { %2559 = shalt.err (!%p2556_p3)
}
  0x45   :  { %32 = dma.hbm_to_vmem [thread:$0]  %s3154_s0, 512, %s2789_s22, [#allocation3], %s2684_s25, %s2684_s25, %s2685_s26  }
  0x46   :  { %s2688_s23 = smov [#allocation7]   ;;  %s2689_s27 = smov [#allocation10]  }
  0x47   :  { %s50_s24 = sshll.u32 %s2688_s23, 4  ;;  %s74_s28 = sshll.u32 %s2689_s27, 4  ;;  %s51_s24 = int_to_ptr.vmem [resolvable:$true] %s50_s24  ;;  %s2826_s28 = int_to_ptr.vmem [resolvable:$true] %s74_s28 }
  0x48   :  { %s2560_s11 = scalar_lea.hbm %s3156_s2, 768 }
  0x49   :  { %p2561_p4 = scmp.ne.s32.totalorder %s3156_s2, %s2560_s11  ;;  %p2564_p5 = scmp.lt.u32.totalorder %s2560_s11, %s3156_s2 }
  0x4b   :  { %p2566_p6 = pnand %p2564_p5, %p2561_p4 }
  0x4d   :  { %2569 = shalt.err (!%p2566_p6)
}
  0x4e   :  { %s2570_s0 = scalar_lea.vmem %s51_s24, 768  ;;  %p2575_p8 = scmp.lt.s32.totalorder %s51_s24, %s51_s24 }
  0x4f   :  { %p2571_p7 = scmp.ne.s32.totalorder %s51_s24, %s2570_s0  ;;  %p2576_p9 = scmp.lt.s32.totalorder %s2570_s0, %s2570_s0 }
  0x51   :  { %p2577_p10 = por %p2576_p9, %p2575_p8 }
  0x53   :  { %p2578_p11 = pnand %p2577_p10, %p2571_p7 }
  0x55   :  { %2581 = shalt.err (!%p2578_p11)
}
  0x56   :  { %56 = dma.hbm_to_vmem [thread:$0]  %s3156_s2, 768, %s51_s24, [#allocation6], %s2684_s25, %s2684_s25, %s2685_s26  }
  0x57   :  { %s2582_s1 = scalar_lea.hbm %s3158_s4, 768 }
  0x58   :  { %p2583_p12 = scmp.ne.s32.totalorder %s3158_s4, %s2582_s1  ;;  %p2586_p13 = scmp.lt.u32.totalorder %s2582_s1, %s3158_s4 }
  0x5a   :  { %p2588_p0 = pnand %p2586_p13, %p2583_p12 }
  0x5c   :  { %2591 = shalt.err (!%p2588_p0)
}
  0x5d   :  { %s2592_s20 = scalar_lea.vmem %s2826_s28, 768  ;;  %p2597_p2 = scmp.lt.s32.totalorder %s2826_s28, %s2826_s28 }
  0x5e   :  { %p2593_p1 = scmp.ne.s32.totalorder %s2826_s28, %s2592_s20  ;;  %p2598_p3 = scmp.lt.s32.totalorder %s2592_s20, %s2592_s20 }
  0x60   :  { %p2599_p4 = por %p2598_p3, %p2597_p2 }
  0x62   :  { %p2600_p5 = pnand %p2599_p4, %p2593_p1 }
  0x64   :  { %2603 = shalt.err (!%p2600_p5)
}
  0x65   :  { %80 = dma.hbm_to_vmem [thread:$0]  %s3158_s4, 768, %s2826_s28, [#allocation9], %s2684_s25, %s2684_s25, %s2685_s26  }
  0x66   :  { %s2690_s24 = smov [#allocation13]   ;;  %s2691_s29 = smov [#allocation14]  }
  0x67   :  { %s98_s27 = sshll.u32 %s2690_s24, 4  ;;  %s110_s30 = sshll.u32 %s2691_s29, 4  ;;  %s99_s27 = int_to_ptr.vmem [resolvable:$true] %s98_s27  ;;  %s2863_s30 = int_to_ptr.vmem [resolvable:$true] %s110_s30 }
  0x68   :  { %s2604_s16 = scalar_lea.hbm %s3160_s6, 768 }
  0x69   :  { %p2605_p6 = scmp.ne.s32.totalorder %s3160_s6, %s2604_s16  ;;  %p2608_p7 = scmp.lt.u32.totalorder %s2604_s16, %s3160_s6 }
  0x6b   :  { %p2610_p8 = pnand %p2608_p7, %p2605_p6 }
  0x6d   :  { %2613 = shalt.err (!%p2610_p8)
}
  0x6e   :  { %s2614_s4 = scalar_lea.vmem %s99_s27, 768  ;;  %p2619_p10 = scmp.lt.s32.totalorder %s99_s27, %s99_s27 }
  0x6f   :  { %p2615_p9 = scmp.ne.s32.totalorder %s99_s27, %s2614_s4  ;;  %p2620_p11 = scmp.lt.s32.totalorder %s2614_s4, %s2614_s4 }
  0x71   :  { %p2621_p12 = por %p2620_p11, %p2619_p10 }
  0x73   :  { %p2622_p13 = pnand %p2621_p12, %p2615_p9 }
  0x75   :  { %2625 = shalt.err (!%p2622_p13)
}
  0x76   :  { %104 = dma.hbm_to_vmem [thread:$0]  %s3160_s6, 768, %s99_s27, [#allocation12], %s2684_s25, %s2684_s25, %s2685_s26  }
  0x77   :  { %s2626_s1 = scalar_lea.hbm %s3161_s7, 768 }
  0x78   :  { %p2627_p0 = scmp.ne.s32.totalorder %s3161_s7, %s2626_s1  ;;  %p2630_p1 = scmp.lt.u32.totalorder %s2626_s1, %s3161_s7 }
  0x7a   :  { %p2632_p2 = pnand %p2630_p1, %p2627_p0 }
  0x7c   :  { %2635 = shalt.err (!%p2632_p2)
}
  0x7d   :  { %s2636_s20 = scalar_lea.vmem %s2863_s30, 768  ;;  %p2641_p4 = scmp.lt.s32.totalorder %s2863_s30, %s2863_s30 }
  0x7e   :  { %p2637_p3 = scmp.ne.s32.totalorder %s2863_s30, %s2636_s20  ;;  %p2642_p5 = scmp.lt.s32.totalorder %s2636_s20, %s2636_s20 }
  0x80   :  { %p2643_p6 = por %p2642_p5, %p2641_p4 }
  0x82   :  { %p2644_p7 = pnand %p2643_p6, %p2637_p3 }
  0x84   :  { %2647 = shalt.err (!%p2644_p7)
}
  0x85   :  { %116 = dma.hbm_to_vmem [thread:$0]  %s3161_s7, 768, %s2863_s30, [#allocation15], %s2684_s25, %s2684_s25, %s2685_s26  }
  0x86   :  { %2670 = dma.done.wait [#allocation3], 512  }
  0x87   :  { %2671 = vsyncadd [#allocation3], 4294966784 }
  0x88   :  { %2672 = dma.done.wait [#allocation6], 1024  }
  0x89   :  { %2673 = vsyncadd [#allocation6], 4294966272 }
  0x8a   :  { %2674 = dma.done.wait [#allocation9], 1536  }
  0x8b   :  { %2675 = vsyncadd [#allocation9], 4294965760 }
  0x8c   :  { %2676 = dma.done.wait [#allocation12], 1536  }
  0x8d   :  { %2677 = vsyncadd [#allocation12], 4294965760 }
  0x8e   :  { %2678 = dma.done.wait [#allocation15], 768  }
  0x8f   :  { %2679 = vsyncadd [#allocation15], 4294966528  ;;  %v271_v0 = vld [vmem:[#allocation8] sm:$0xff]  ;;  %v272_v1 = vld [vmem:[#allocation8 + $0x8] sm:$0xff]  ;;  %vm182_vm0 = vcmask 1045504   ;;  %vm169_vm1 = vcmask 375808   ;;  %v165_v23 = vlaneseq }
  0x90   :  { %v159_v2 = vld [vmem:[#allocation7] sm:$0xff]  ;;  %v2333_v3 = vpack.c.bf16 %v272_v1, %v271_v0  ;;  %v160_v4 = vld [vmem:[#allocation7 + $0x8] sm:$0xff]  ;;  %v161_v9 = vld [vmem:[#allocation7 + $0x10] sm:$0xff]  ;;  %vm2692_vm2 = vmmov 1   ;;  %vm368_vm4 = vcmask 187392   ;;  %s2693_s29 = smov 105  }
  0x91   :  { %v273_v5 = vld [vmem:[#allocation8 + $0x10] sm:$0xff]  ;;  %v274_v6 = vld [vmem:[#allocation8 + $0x18] sm:$0xff]  ;;  %v2319_v7 = vpack.c.bf16 %v160_v4, %v159_v2  ;;  %v162_v10 = vld [vmem:[#allocation7 + $0x18] sm:$0xff]  ;;  %v2923_v24 = vshrl.u32 %v165_v23, 7  ;;  %vm455_vm5 = vcmask 64512   ;;  %s2695_s30 = smov 82  }
  0x92   :  { %v2337_v8 = vpack.c.bf16 %v274_v6, %v273_v5  ;;  %v275_v11 = vld [vmem:[#allocation8 + $0x20] sm:$0xff]  ;;  %2334 = vmatprep.subr.bf16.mxu1 %v2333_v3  ;;  %v2323_v12 = vpack.c.bf16 %v162_v10, %v161_v9  ;;  %v276_v13 = vld [vmem:[#allocation8 + $0x28] sm:$0x3f]  ;;  %v163_v14 = vld [vmem:[#allocation7 + $0x20] sm:$0xff]  ;;  %vm761_vm6 = vcmask 1040384   ;;  %vm777_vm7 = vcmask 1046528  }
  0x93   :  { %v164_v15 = vld [vmem:[#allocation7 + $0x28] sm:$0x3f]  ;;  %2336 = vmatpush3.bf16.msra.mxu1 %v2333_v3  ;;  %2320 = vmatprep.subr.bf16.mxu0 %v2319_v7  ;;  %v149_v16 = vld [vmem:[#allocation5] sm:$0xff]  ;;  %v2341_v18 = vpack.c.bf16 %v276_v13, %v275_v11  ;;  %vm2903_vm3 = vmpackc.low %vm182_vm0, %vm2692_vm2  ;;  %v167_v25 = vsub.s32 0, %v2923_v24 }
  0x94   :  { %v2900_v17 = vld [vmem:[#allocation2] sm:$0xff]  ;;  %2322 = vmatpush3.bf16.msra.mxu0 %v2319_v7  ;;  %2338 = vmatprep.subr.bf16.mxu1 %v2337_v8  ;;  %v2327_v20 = vpack.c.bf16 %v164_v15, %v163_v14  ;;  %v150_v21 = vld [vmem:[#allocation5 + $0x8] sm:$0xff]  ;;  %v2959_v46 = vld [vmem:[#allocation2 + $0x10] sm:$0xff] }
  0x95   :  { %2324 = vmatprep.subr.bf16.mxu0 %v2323_v12  ;;  %2186 = vmatprep.mubr.msk.f32.mxu1 %vm169_vm1, %v149_v16  ;;  %v2918_v22 = vld [vmem:[#allocation2 + $0x8] sm:$0xff]  ;;  %v2929_v26 = vld [vmem:[%s3163_s9] sm:$0xff]  ;;  %v2961_v47 = vld [vmem:[#allocation2 + $0x18] sm:$0xff] }
  0x96   :  { %2168 = vmatprep.mubr.msk.f32.mxu0 %vm169_vm1, %v2900_v17  ;;  %v2012_v27 = vld [vmem:[%s3162_s8] ss:$0 sm:$0xff]  ;;  %v2935_v28 = vrot.slane %v2929_v26, %v167_v25  ;;  %s2694_s8 = smov 59  }
  0x97   :  { %2340 = vmatpush3.bf16.msra.mxu1 %v2337_v8 }
  0x98   :  { %2326 = vmatpush3.bf16.msra.mxu0 %v2323_v12  ;;  %2343 = vmatprep.subr.msk.bf16.mxu1 %vm2903_vm3, %v2341_v18 }
  0x99   :  { %2329 = vmatprep.subr.msk.bf16.mxu0 %vm2903_vm3, %v2327_v20 }
  0x9b   :  { %2346 = vmatpush3.bf16.msk.msra.mxu1 %vm2903_vm3, %v2341_v18 }
  0x9c   :  { %2332 = vmatpush3.bf16.msk.msra.mxu0 %vm2903_vm3, %v2327_v20 }
  0x9e   :  { %2187 = vmatmul.mubr.msk.f32.vlgmr.msra.gmra.mrb[0].mxu1 %vm169_vm1, %v150_v21 }
  0x9f   :  { %2169 = vmatmul.mubr.msk.f32.vlgmr.msra.gmra.mrb[0].mxu0 %vm169_vm1, %v2918_v22 }
  0xa0   :  { %2171 = vmatprep.mubr.msk.f32.mxu0 %vm169_vm1, %v2959_v46 }
  0xa3   :  { %2172 = vmatmul.mubr.msk.f32.gmra.mrb[2].mxu0 %vm169_vm1, %v2961_v47 }
 0x171   :  { %v2188_v29 = vpop.f32.mrb[0].mxu1 }
 0x172   :  { %v2937_v30 = vadd.f32 %v2188_v29, %v2012_v27  ;;  %v359_v31 = vpop.f32.mrb[1].mxu1  ;;  %v2170_v32 = vpop.f32.mrb[0].mxu0 }
 0x173   :  { %v2939_v33 = vadd.f32 %v2012_v27, %v359_v31  ;;  %v258_v34 = vadd.f32 %v2170_v32, %v2935_v28  ;;  %v252_v35 = vpop.f32.mrb[1].mxu0 }
 0x174   :  { %v253_v36 = vadd.f32 %v252_v35, %v2935_v28  ;;  %v2992_v35 = vld [vmem:[#allocation10 + $0x10] sm:$0xff] }
 0x175   :  { %566 = vrot.lane.b32.xlu0 %v2939_v33, %s2693_s29  ;;  %2189 = vmatprep.subr.msk.mxu1 %vm368_vm4, %v2939_v33 }
 0x176   :  { %2190 = vmatpush3.xpose.msk.msra.mxu1 %vm368_vm4, %v2939_v33  ;;  %564 = vrot.lane.b32.xlu1 %v258_v34, %s2693_s29  ;;  %v2173_v10 = vpop.f32.mrb[2].mxu0 }
 0x177   :  { %2191 = vmatprep.mubr.msk.f32.mxu1 %vm368_vm4, %v253_v36  ;;  %v262_v12 = vpop.f32.mrb[3].mxu0 }
 0x178   :  { %v2982_v32 = vadd.f32 %v262_v12, %v2935_v28 }
 0x179   :  { %562 = vrot.lane.b32.xlu0 %v253_v36, %s2693_s29  ;;  %2192 = vmatmul.mubr.msk.f32.vlgmr.msra.gmra.mrb[2].mxu1 %vm368_vm4, %v258_v34  ;;  %v268_v34 = vadd.f32 %v2173_v10, %v2935_v28  ;;  %v154_v36 = vld [vmem:[#allocation10 + $0x18] sm:$0xff] }
 0x1e7   :  { %v567_v37 = vpop.permute.xlu0 %566 }
 0x1e8   :  { %2199 = vmatprep.subr.msk.mxu1 %vm368_vm4, %v567_v37  ;;  %v565_v39 = vpop.permute.xlu1 %564 }
 0x1e9   :  { %2200 = vmatpush3.xpose.msk.msra.mxu1 %vm368_vm4, %v567_v37  ;;  %v155_v37 = vld [vmem:[#allocation10 + $0x20] sm:$0xff] }
 0x1eb   :  { %v563_v38 = vpop.permute.xlu0 %562 }
 0x1ec   :  { %2201 = vmatprep.mubr.msk.f32.mxu1 %vm368_vm4, %v563_v38  ;;  %v762_v38 = vrot.slane %v2992_v35, 7 }
 0x1ed   :  { %2202 = vmatmul.mubr.msk.f32.vlgmr.msra.gmra.mrb[4].mxu1 %vm368_vm4, %v565_v39  ;;  %v763_v39 = vrot.slane %v154_v36, 7 }
 0x24c   :  { %v2193_v40 = vpop.f32.mrb[2].mxu1 }
 0x24d   :  { %v454_v41 = vmul.f32 0.2085144, %v2193_v40  ;;  %v444_v42 = vpop.f32.mrb[3].mxu1  ;;  %v765_v40 = vrot.slane %v155_v37, 7 }
 0x24e   :  { %v453_v43 = vmul.f32 0.2085144, %v444_v42 }
 0x24f   :  { %v459_v44 = vsel %vm455_vm5, %v454_v41, -inf  ;;  %v766_v42 = vsel %vm761_vm6, %v763_v39, %v765_v40 }
 0x250   :  { %460 = vmax.xlane.f32.xlu0 %v459_v44  ;;  %v456_v45 = vsel %vm455_vm5, %v453_v43, -inf  ;;  %v156_v44 = vld [vmem:[#allocation10 + $0x28] sm:$0x3f] }
 0x251   :  { %457 = vmax.xlane.f32.xlu1 %v456_v45  ;;  %v767_v28 = vrot.slane %v156_v44, 7 }
 0x253   :  { %v2999_v45 = vsel %vm761_vm6, %v765_v40, %v767_v28  ;;  %v1489_v40 = vsub.s32 1, %v2923_v24 }
 0x2c0   :  { %v2203_v48 = vpop.f32.mrb[4].mxu1 }
 0x2c1   :  { %v650_v49 = vmul.f32 0.2085144, %v2203_v48  ;;  %v640_v50 = vpop.f32.mrb[5].mxu1  ;;  %v151_v48 = vld [vmem:[#allocation10] sm:$0xff] }
 0x2c2   :  { %v649_v51 = vmul.f32 0.2085144, %v640_v50 }
 0x2c3   :  { %v654_v52 = vsel %vm455_vm5, %v650_v49, -inf }
 0x2c4   :  { %655 = vmax.xlane.f32.xlu1 %v654_v52  ;;  %v651_v53 = vsel %vm455_vm5, %v649_v51, -inf }
 0x2c5   :  { %652 = vmax.xlane.f32.xlu0 %v651_v53 }
 0x2dd   :  { %v461_v54 = vpop.xlane.xlu0 %460 }
 0x2de   :  { %v463_v55 = vsub.f32 %v454_v41, %v461_v54  ;;  %v458_v56 = vpop.xlane.xlu1 %457  ;;  %v764_v41 = vsel %vm761_vm6, %v762_v38, %v763_v39 }
 0x2df   :  { %v462_v57 = vsub.f32 %v453_v43, %v458_v56  ;;  %v2995_v43 = vpack.c.bf16 %v766_v42, %v764_v41  ;;  %v1490_v42 = vrot.slane %v2929_v26, %v1489_v40 }
 0x2e0   :  { %v466_v58 = vmul.f32 1.442695, %v463_v55 }
 0x2e1   :  { %v464_v59 = vmul.f32 1.442695, %v462_v57  ;;  %2348 = vmatprep.subr.bf16.mxu1 %v2995_v43 }
 0x2e2   :  { %2424 = vpow2.f32 %v466_v58  ;;  %2350 = vmatpush3.bf16.msra.mxu1 %v2995_v43 }
 0x2e3   :  { %2426 = vpow2.f32 %v464_v59  ;;  %2213 = vmatprep.subr.msk.mxu1 %vm777_vm7, %v2999_v45 }
 0x2e6   :  { %2214 = vmatpush3.msk.msra.mxu1 %vm777_vm7, %v2999_v45 }
 0x2ec   :  { %v2425_v60 = vpop.eup %2424 }
 0x2ed   :  { %v2427_v61 = vpop.eup %2426  ;;  %v471_v62 = vsel %vm455_vm5, %v2425_v60, 0.0 }
 0x2ee   :  { %472 = vadd.xlane.f32.xlu1 %v471_v62  ;;  %v468_v63 = vsel %vm455_vm5, %v2427_v61, 0.0 }
 0x2ef   :  { %469 = vadd.xlane.f32.xlu0 %v468_v63 }
 0x351   :  { %v656_v0 = vpop.xlane.xlu1 %655 }
 0x352   :  { %v658_v1 = vsub.f32 %v650_v49, %v656_v0  ;;  %v653_v2 = vpop.xlane.xlu0 %652  ;;  %v152_v49 = vld [vmem:[#allocation10 + $0x8] sm:$0xff] }
 0x353   :  { %v657_v3 = vsub.f32 %v649_v51, %v653_v2  ;;  %v3005_v50 = vpack.c.bf16 %v152_v49, %v151_v48 }
 0x354   :  { %v661_v4 = vmul.f32 1.442695, %v658_v1 }
 0x355   :  { %v659_v5 = vmul.f32 1.442695, %v657_v3  ;;  %2352 = vmatprep.subr.bf16.mxu1 %v3005_v50 }
 0x356   :  { %2428 = vpow2.f32 %v661_v4 }
 0x357   :  { %2430 = vpow2.f32 %v659_v5 }
 0x360   :  { %v2429_v6 = vpop.eup %2428 }
 0x361   :  { %v2431_v7 = vpop.eup %2430  ;;  %v666_v8 = vsel %vm455_vm5, %v2429_v6, 0.0 }
 0x362   :  { %667 = vadd.xlane.f32.xlu1 %v666_v8  ;;  %v663_v9 = vsel %vm455_vm5, %v2431_v7, 0.0 }
 0x363   :  { %664 = vadd.xlane.f32.xlu0 %v663_v9 }
 0x373   :  { %673 = vrot.lane.b32.xlu1 %v2939_v33, %s2694_s8 }
 0x379   :  { %478 = vrot.lane.b32.xlu0 %v2939_v33, %s2695_s30 }
 0x37b   :  { %v473_v15 = vpop.xlane.xlu1 %472 }
 0x37c   :  { %v470_v11 = vpop.xlane.xlu0 %469 }
 0x37d   :  { %2432 = vrcp.f32 %v470_v11 }
 0x37e   :  { %2434 = vrcp.f32 %v473_v15 }
 0x387   :  { %v2433_v13 = vpop.eup %2432 }
 0x388   :  { %v476_v14 = vmul.f32 %v2433_v13, %v2427_v61  ;;  %v2435_v20 = vpop.eup %2434 }
 0x389   :  { %v477_v23 = vmul.f32 %v2435_v20, %v2425_v60 }
 0x38a   :  { %2196 = vmatprep.mubr.msk.f32.mxu0 %vm455_vm5, %v476_v14 }
 0x3ef   :  { %v668_v16 = vpop.xlane.xlu1 %667 }
 0x3f0   :  { %2436 = vrcp.f32 %v668_v16  ;;  %v665_v18 = vpop.xlane.xlu0 %664 }
 0x3f1   :  { %2438 = vrcp.f32 %v665_v18 }
 0x3f3   :  { %v674_v25 = vpop.permute.xlu1 %673 }
 0x3f4   :  { %v479_v21 = vpop.permute.xlu0 %478 }
 0x3f5   :  { %2194 = vmatprep.subr.mxu0 %v479_v21 }
 0x3f6   :  { %2195 = vmatpush3.msra.mxu0 %v479_v21 }
 0x3f7   :  { %2197 = vmatmul.mubr.msk.f32.vlgmr.msra.gmra.mrb[4].mxu0 %vm455_vm5, %v477_v23  ;;  %2204 = vmatprep.subr.mxu0 %v674_v25 }
 0x3f8   :  { %2205 = vmatpush3.msra.mxu0 %v674_v25 }
 0x3f9   :  { %2227 = vmatprep.subr.msk.mxu0 %vm368_vm4, %v2937_v30 }
 0x3fa   :  { %v2437_v27 = vpop.eup %2436 }
 0x3fb   :  { %v2439_v29 = vpop.eup %2438  ;;  %v672_v33 = vmul.f32 %v2437_v27, %v2429_v6 }
 0x3fc   :  { %v671_v31 = vmul.f32 %v2439_v29, %v2431_v7 }
 0x3fe   :  { %2206 = vmatprep.mubr.msk.f32.mxu0 %vm455_vm5, %v671_v31 }
 0x3ff   :  { %2207 = vmatmul.mubr.msk.f32.vlgmr.msra.gmra.mrb[6].mxu0 %vm455_vm5, %v672_v33 }
 0x400   :  { %2228 = vmatpush3.xpose.msk.msra.mxu0 %vm368_vm4, %v2937_v30  ;;  %2229 = vmatprep.mubr.msk.f32.mxu0 %vm368_vm4, %v2982_v32 }
 0x403   :  { %2230 = vmatmul.mubr.msk.f32.vlgmr.msra.gmra.mrb[8].mxu0 %vm368_vm4, %v268_v34 }
 0x4ca   :  { %v2198_v51 = vpop.f32.mrb[4].mxu0 }
 0x4cb   :  { %v553_v52 = vpop.f32.mrb[5].mxu0 }
 0x4d2   :  { %v2208_v53 = vpop.f32.mrb[6].mxu0 }
 0x4d3   :  { %v748_v54 = vpop.f32.mrb[7].mxu0 }
 0x4d4   :  { %2215 = vmatprep.mubr.msk.f32.mxu1 %vm368_vm4, %v748_v54 }
 0x4d5   :  { %2216 = vmatmul.mubr.msk.f32.vlgmr.msra.gmra.mrb[6].mxu1 %vm368_vm4, %v2208_v53 }
 0x4d6   :  { %2224 = vmatprep.mubr.msk.f32.mxu1 %vm368_vm4, %v553_v52  ;;  %v2231_v55 = vpop.f32.mrb[8].mxu0  ;;  %2354 = vmatpush3.bf16.msra.mxu1 %v3005_v50 }
 0x4d7   :  { %v1023_v56 = vmul.f32 0.2085144, %v2231_v55  ;;  %v1013_v57 = vpop.f32.mrb[9].mxu0  ;;  %2222 = vmatprep.subr.msk.mxu1 %vm777_vm7, %v2992_v35 }
 0x4d8   :  { %v1022_v58 = vmul.f32 0.2085144, %v1013_v57 }
 0x4d9   :  { %v1027_v59 = vsel %vm455_vm5, %v1023_v56, -inf }
 0x4da   :  { %1028 = vmax.xlane.f32.xlu0 %v1027_v59  ;;  %v1024_v60 = vsel %vm455_vm5, %v1022_v58, -inf  ;;  %2223 = vmatpush3.msk.msra.mxu1 %vm777_vm7, %v2992_v35 }
 0x4db   :  { %1025 = vmax.xlane.f32.xlu1 %v1024_v60 }
 0x4dd   :  { %2225 = vmatmul.mubr.msk.f32.vlgmr.msra.gmra.mrb[6].mxu1 %vm368_vm4, %v2198_v51 }
 0x567   :  { %v1029_v61 = vpop.xlane.xlu0 %1028 }
 0x568   :  { %v1031_v62 = vsub.f32 %v1023_v56, %v1029_v61  ;;  %v1026_v63 = vpop.xlane.xlu1 %1025 }
 0x569   :  { %v1030_v0 = vsub.f32 %v1022_v58, %v1026_v63 }
 0x56a   :  { %v1034_v1 = vmul.f32 1.442695, %v1031_v62 }
 0x56b   :  { %v1032_v2 = vmul.f32 1.442695, %v1030_v0 }
 0x56c   :  { %2440 = vpow2.f32 %v1034_v1 }
 0x56d   :  { %2442 = vpow2.f32 %v1032_v2 }
 0x576   :  { %v2441_v3 = vpop.eup %2440 }
 0x577   :  { %v2443_v4 = vpop.eup %2442  ;;  %v1039_v5 = vsel %vm455_vm5, %v2441_v3, 0.0 }
 0x578   :  { %1040 = vadd.xlane.f32.xlu1 %v1039_v5  ;;  %v1036_v6 = vsel %vm455_vm5, %v2443_v4, 0.0 }
 0x579   :  { %1037 = vadd.xlane.f32.xlu0 %v1036_v6 }
 0x589   :  { %1134 = vrot.lane.b32.xlu1 %v2937_v30, %s2693_s29 }
 0x58d   :  { %1130 = vrot.lane.b32.xlu1 %v2982_v32, %s2693_s29 }
 0x58f   :  { %1046 = vrot.lane.b32.xlu0 %v2937_v30, %s2695_s30 }
 0x593   :  { %1132 = vrot.lane.b32.xlu0 %v268_v34, %s2693_s29 }
 0x5b0   :  { %v2226_v7 = vpop.f32.mrb[6].mxu1 }
 0x5b1   :  { %v929_v8 = vpop.f32.mrb[7].mxu1 }
 0x605   :  { %v1041_v9 = vpop.xlane.xlu1 %1040 }
 0x606   :  { %2444 = vrcp.f32 %v1041_v9  ;;  %v1038_v10 = vpop.xlane.xlu0 %1037 }
 0x607   :  { %2446 = vrcp.f32 %v1038_v10 }
 0x609   :  { %v1135_v12 = vpop.permute.xlu1 %1134 }
 0x60a   :  { %v1047_v11 = vpop.permute.xlu0 %1046 }
 0x60b   :  { %2232 = vmatprep.subr.mxu0 %v1047_v11 }
 0x60c   :  { %2233 = vmatpush3.msra.mxu0 %v1047_v11 }
 0x60d   :  { %2237 = vmatprep.subr.msk.mxu0 %vm368_vm4, %v1135_v12  ;;  %v1131_v18 = vpop.permute.xlu1 %1130 }
 0x60e   :  { %v1133_v20 = vpop.permute.xlu0 %1132 }
 0x610   :  { %v2445_v13 = vpop.eup %2444 }
 0x611   :  { %v2447_v14 = vpop.eup %2446  ;;  %v1045_v16 = vmul.f32 %v2445_v13, %v2441_v3  ;;  %v1569_v13 = vld [vmem:[#allocation11 + $0x8] sm:$0xff] }
 0x612   :  { %v1044_v15 = vmul.f32 %v2447_v14, %v2443_v4 }
 0x614   :  { %2234 = vmatprep.mubr.msk.f32.mxu0 %vm455_vm5, %v1044_v15  ;;  %v1570_v15 = vld [vmem:[#allocation11 + $0x10] sm:$0xff] }
 0x615   :  { %2235 = vmatmul.mubr.msk.f32.vlgmr.msra.gmra.mrb[10].mxu0 %vm455_vm5, %v1045_v16 }
 0x616   :  { %2238 = vmatpush3.xpose.msk.msra.mxu0 %vm368_vm4, %v1135_v12  ;;  %2239 = vmatprep.mubr.msk.f32.mxu0 %vm368_vm4, %v1131_v18  ;;  %v1572_v18 = vld [vmem:[#allocation11 + $0x20] sm:$0xff] }
 0x617   :  { %2356 = vmatprep.subr.bf16.mxu0 %v2995_v43 }
 0x619   :  { %2240 = vmatmul.mubr.msk.f32.vlgmr.msra.gmra.mrb[12].mxu0 %vm368_vm4, %v1133_v20  ;;  %v1573_v20 = vld [vmem:[#allocation11 + $0x28] sm:$0x3f] }
 0x61a   :  { %2358 = vmatpush3.bf16.msra.mxu0 %v2995_v43  ;;  %v1491_v43 = vadd.f32 %v1490_v42, %v929_v8 }
 0x61b   :  { %2251 = vmatprep.subr.msk.mxu0 %vm777_vm7, %v2999_v45 }
 0x61c   :  { %v1495_v49 = vadd.f32 %v1491_v43, %v2900_v17 }
 0x61e   :  { %2252 = vmatpush3.msk.msra.mxu0 %vm777_vm7, %v2999_v45  ;;  %v1492_v45 = vadd.f32 %v2226_v7, %v1490_v42  ;;  %v1499_v52 = vsel %vm169_vm1, %v1495_v49, 0.0 }
 0x61f   :  { %2360 = vmatprep.subr.bf16.mxu0 %v3005_v50 }
 0x620   :  { %v1496_v53 = vadd.f32 %v1492_v45, %v2918_v22 }
 0x622   :  { %v1502_v54 = vsel %vm169_vm1, %v1496_v53, 0.0 }
 0x6e8   :  { %v2236_v21 = vpop.f32.mrb[10].mxu0 }
 0x6e9   :  { %v1121_v23 = vpop.f32.mrb[11].mxu0 }
 0x6ec   :  { %v2241_v25 = vpop.f32.mrb[12].mxu0 }
 0x6ed   :  { %v1218_v27 = vmul.f32 0.2085144, %v2241_v25  ;;  %v1208_v29 = vpop.f32.mrb[13].mxu0 }
 0x6ee   :  { %v1217_v31 = vmul.f32 0.2085144, %v1208_v29 }
 0x6ef   :  { %v1222_v32 = vsel %vm455_vm5, %v1218_v27, -inf }
 0x6f0   :  { %1223 = vmax.xlane.f32.xlu0 %v1222_v32  ;;  %v1219_v33 = vsel %vm455_vm5, %v1217_v31, -inf }
 0x6f1   :  { %1220 = vmax.xlane.f32.xlu1 %v1219_v33 }
 0x77d   :  { %v1224_v34 = vpop.xlane.xlu0 %1223 }
 0x77e   :  { %v1226_v36 = vsub.f32 %v1218_v27, %v1224_v34  ;;  %v1221_v37 = vpop.xlane.xlu1 %1220 }
 0x77f   :  { %v1225_v38 = vsub.f32 %v1217_v31, %v1221_v37 }
 0x780   :  { %v1229_v39 = vmul.f32 1.442695, %v1226_v36 }
 0x781   :  { %v1227_v41 = vmul.f32 1.442695, %v1225_v38 }
 0x782   :  { %2448 = vpow2.f32 %v1229_v39 }
 0x783   :  { %2450 = vpow2.f32 %v1227_v41 }
 0x78c   :  { %v2449_v44 = vpop.eup %2448 }
 0x78d   :  { %v2451_v28 = vpop.eup %2450  ;;  %v1234_v48 = vsel %vm455_vm5, %v2449_v44, 0.0 }
 0x78e   :  { %1235 = vadd.xlane.f32.xlu1 %v1234_v48  ;;  %v1231_v51 = vsel %vm455_vm5, %v2451_v28, 0.0 }
 0x78f   :  { %1232 = vadd.xlane.f32.xlu0 %v1231_v51 }
 0x792   :  { %1500 = vadd.xlane.f32.xlu1 %v1499_v52 }
 0x796   :  { %1503 = vadd.xlane.f32.xlu1 %v1502_v54 }
 0x7a5   :  { %1241 = vrot.lane.b32.xlu0 %v2937_v30, %s2694_s8 }
 0x81b   :  { %v1236_v55 = vpop.xlane.xlu1 %1235 }
 0x81c   :  { %2452 = vrcp.f32 %v1236_v55  ;;  %v1233_v56 = vpop.xlane.xlu0 %1232 }
 0x81d   :  { %2454 = vrcp.f32 %v1233_v56 }
 0x81f   :  { %v1501_v30 = vpop.xlane.xlu1 %1500 }
 0x820   :  { %v1242_v17 = vpop.permute.xlu0 %1241  ;;  %v1512_v0 = vmul.f32 0.02173913, %v1501_v30  ;;  %v1686_v30 = vld [vmem:[#allocation13 + $0x20] sm:$0xff] }
 0x821   :  { %2242 = vmatprep.subr.mxu1 %v1242_v17 }
 0x822   :  { %2243 = vmatpush3.msra.mxu1 %v1242_v17  ;;  %v1516_v5 = vsub.f32 %v1495_v49, %v1512_v0 }
 0x823   :  { %v1504_v3 = vpop.xlane.xlu1 %1503 }
 0x824   :  { %v1513_v6 = vmul.f32 0.02173913, %v1504_v3  ;;  %v1520_v9 = vmul.f32 %v1516_v5, %v1516_v5 }
 0x826   :  { %v2453_v57 = vpop.eup %2452  ;;  %v1517_v8 = vsub.f32 %v1496_v53, %v1513_v6  ;;  %v1524_v10 = vsel %vm169_vm1, %v1520_v9, 0.0 }
 0x827   :  { %v2455_v58 = vpop.eup %2454  ;;  %v1240_v60 = vmul.f32 %v2453_v57, %v2449_v44  ;;  %v1554_v44 = vsub.s32 2, %v2923_v24  ;;  %v1682_v57 = vld [vmem:[#allocation13] sm:$0xff] }
 0x828   :  { %v1239_v59 = vmul.f32 %v2455_v58, %v2451_v28  ;;  %v1521_v11 = vmul.f32 %v1517_v8, %v1517_v8  ;;  %v1562_v28 = vsub.s32 3, %v2923_v24  ;;  %v1683_v58 = vld [vmem:[#allocation13 + $0x8] sm:$0xff] }
 0x829   :  { %v1555_v45 = vrot.slane %v2929_v26, %v1554_v44 }
 0x82a   :  { %2244 = vmatprep.mubr.msk.f32.mxu1 %vm455_vm5, %v1239_v59  ;;  %v1527_v12 = vsel %vm169_vm1, %v1521_v11, 0.0  ;;  %v1563_v51 = vrot.slane %v2929_v26, %v1562_v28  ;;  %v1684_v59 = vld [vmem:[#allocation13 + $0x10] sm:$0xff] }
 0x82b   :  { %2245 = vmatmul.mubr.msk.f32.vlgmr.msra.gmra.mrb[8].mxu1 %vm455_vm5, %v1240_v60  ;;  %v2377_v60 = vpack.c.bf16 %v1683_v58, %v1682_v57  ;;  %v1804_v57 = vsub.s32 6, %v2923_v24 }
 0x82d   :  { %v1805_v58 = vrot.slane %v2929_v26, %v1804_v57 }
 0x8fe   :  { %v2246_v22 = vpop.f32.mrb[8].mxu1 }
 0x8ff   :  { %v1316_v61 = vpop.f32.mrb[9].mxu1 }
 0x900   :  { %2253 = vmatprep.mubr.msk.f32.mxu0 %vm368_vm4, %v1316_v61 }
 0x901   :  { %2254 = vmatmul.mubr.msk.f32.vlgmr.msra.gmra.mrb[14].mxu0 %vm368_vm4, %v2246_v22  ;;  %v1685_v22 = vld [vmem:[#allocation13 + $0x18] sm:$0xff] }
 0x902   :  { %2262 = vmatprep.mubr.msk.f32.mxu0 %vm368_vm4, %v1121_v23  ;;  %2362 = vmatpush3.bf16.msra.mxu0 %v3005_v50  ;;  %v2381_v61 = vpack.c.bf16 %v1685_v22, %v1684_v59 }
 0x903   :  { %2260 = vmatprep.subr.msk.mxu0 %vm777_vm7, %v2992_v35 }
 0x906   :  { %2261 = vmatpush3.msk.msra.mxu0 %vm777_vm7, %v2992_v35 }
 0x907   :  { %2378 = vmatprep.subr.bf16.mxu0 %v2377_v60 }
 0x909   :  { %2263 = vmatmul.mubr.msk.f32.vlgmr.msra.gmra.mrb[14].mxu0 %vm368_vm4, %v2236_v21  ;;  %v2371_v21 = vpack.c.bf16 %v1573_v20, %v1572_v18  ;;  %v1796_v20 = vld [vmem:[#allocation14] sm:$0xff] }
 0x90a   :  { %2380 = vmatpush3.bf16.msra.mxu0 %v2377_v60 }
 0x90b   :  { %2382 = vmatprep.subr.bf16.mxu0 %v2381_v61 }
 0x90e   :  { %2384 = vmatpush3.bf16.msra.mxu0 %v2381_v61 }
 0x9dc   :  { %v2264_v62 = vpop.f32.mrb[14].mxu0 }
 0x9dd   :  { %v1478_v63 = vpop.f32.mrb[15].mxu0  ;;  %v1494_v1 = vadd.f32 %v2264_v62, %v1490_v42  ;;  %v1687_v62 = vld [vmem:[#allocation13 + $0x28] sm:$0x3f] }
 0x9de   :  { %v1493_v2 = vadd.f32 %v1490_v42, %v1478_v63  ;;  %v2385_v63 = vpack.c.bf16 %v1687_v62, %v1686_v30 }
 0x9df   :  { %v1498_v7 = vadd.f32 %v1494_v1, %v2961_v47  ;;  %v1571_v47 = vld [vmem:[#allocation11 + $0x18] sm:$0xff] }
 0x9e0   :  { %v1497_v4 = vadd.f32 %v1493_v2, %v2959_v46  ;;  %v1568_v46 = vld [vmem:[#allocation11] sm:$0xff]  ;;  %v2367_v16 = vpack.c.bf16 %v1571_v47, %v1570_v15  ;;  %2387 = vmatprep.subr.msk.bf16.mxu0 %vm2903_vm3, %v2385_v63 }
 0x9e1   :  { %v1508_v35 = vsel %vm169_vm1, %v1498_v7, 0.0  ;;  %v2363_v14 = vpack.c.bf16 %v1569_v13, %v1568_v46  ;;  %2390 = vmatpush3.bf16.msk.msra.mxu0 %vm2903_vm3, %v2385_v63 }
 0x9e2   :  { %v1505_v50 = vsel %vm169_vm1, %v1497_v4, 0.0 }
 0x9e3   :  { %1506 = vadd.xlane.f32.xlu1 %v1505_v50  ;;  %2364 = vmatprep.subr.bf16.mxu1 %v2363_v14 }
 0x9e4   :  { %2366 = vmatpush3.bf16.msra.mxu1 %v2363_v14 }
 0x9e5   :  { %2368 = vmatprep.subr.bf16.mxu1 %v2367_v16 }
 0x9e7   :  { %1509 = vadd.xlane.f32.xlu1 %v1508_v35 }
 0x9e8   :  { %2370 = vmatpush3.bf16.msra.mxu1 %v2367_v16 }
 0x9e9   :  { %2373 = vmatprep.subr.msk.bf16.mxu1 %vm2903_vm3, %v2371_v21 }
 0x9eb   :  { %1525 = vadd.xlane.f32.xlu1 %v1524_v10 }
 0x9ec   :  { %2376 = vmatpush3.bf16.msk.msra.mxu1 %vm2903_vm3, %v2371_v21  ;;  %v1797_v21 = vld [vmem:[#allocation14 + $0x8] sm:$0xff] }
 0x9ef   :  { %1528 = vadd.xlane.f32.xlu1 %v1527_v12  ;;  %v1576_v12 = vsub.s32 4, %v2923_v24 }
 0x9f1   :  { %v1577_v46 = vrot.slane %v2929_v26, %v1576_v12 }
 0xa70   :  { %v1507_v23 = vpop.xlane.xlu1 %1506 }
 0xa71   :  { %v1514_v25 = vmul.f32 0.02173913, %v1507_v23  ;;  %v1798_v23 = vld [vmem:[#allocation14 + $0x10] sm:$0xff] }
 0xa73   :  { %v1518_v27 = vsub.f32 %v1497_v4, %v1514_v25  ;;  %v2391_v25 = vpack.c.bf16 %v1797_v21, %v1796_v20 }
 0xa74   :  { %v1510_v29 = vpop.xlane.xlu1 %1509 }
 0xa75   :  { %v1515_v31 = vmul.f32 0.02173913, %v1510_v29  ;;  %v1522_v32 = vmul.f32 %v1518_v27, %v1518_v27  ;;  %2392 = vmatprep.subr.bf16.mxu1 %v2391_v25 }
 0xa77   :  { %v1519_v33 = vsub.f32 %v1498_v7, %v1515_v31  ;;  %v1530_v34 = vsel %vm169_vm1, %v1522_v32, 0.0  ;;  %v1800_v31 = vld [vmem:[#allocation14 + $0x20] sm:$0xff]  ;;  %v1801_v32 = vld [vmem:[#allocation14 + $0x28] sm:$0x3f] }
 0xa78   :  { %1531 = vadd.xlane.f32.xlu0 %v1530_v34  ;;  %v1526_v36 = vpop.xlane.xlu1 %1525 }
 0xa79   :  { %v1536_v37 = vmul.f32 0.02173913, %v1526_v36  ;;  %v1523_v38 = vmul.f32 %v1519_v33, %v1519_v33 }
 0xa7b   :  { %v1540_v39 = vadd.f32 1e-05, %v1536_v37  ;;  %v1533_v40 = vsel %vm169_vm1, %v1523_v38, 0.0 }
 0xa7c   :  { %1534 = vadd.xlane.f32.xlu1 %v1533_v40  ;;  %v1529_v41 = vpop.xlane.xlu1 %1528 }
 0xa7d   :  { %2456 = vrsqrt.f32 %v1540_v39  ;;  %v1537_v42 = vmul.f32 0.02173913, %v1529_v41  ;;  %v1690_v41 = vsub.s32 5, %v2923_v24 }
 0xa7f   :  { %v1541_v43 = vadd.f32 1e-05, %v1537_v42  ;;  %v1691_v42 = vrot.slane %v2929_v26, %v1690_v41  ;;  %v1968_v41 = vsub.s32 7, %v2923_v24 }
 0xa81   :  { %2458 = vrsqrt.f32 %v1541_v43 }
 0xa87   :  { %v2457_v48 = vpop.eup %2456 }
 0xa88   :  { %v1548_v49 = vmul.f32 %v2457_v48, %v1516_v5 }
 0xa8a   :  { %v1556_v52 = vmul.f32 %v1555_v45, %v1548_v49 }
 0xa8b   :  { %v2459_v53 = vpop.eup %2458 }
 0xa8c   :  { %v1549_v54 = vmul.f32 %v2459_v53, %v1517_v8  ;;  %v3080_v55 = vadd.f32 %v1563_v51, %v1556_v52 }
 0xa8e   :  { %2277 = vmatprep.mubr.msk.f32.mxu1 %vm169_vm1, %v3080_v55  ;;  %v1557_v56 = vmul.f32 %v1555_v45, %v1549_v54 }
 0xa90   :  { %v3084_v17 = vadd.f32 %v1563_v51, %v1557_v56 }
 0xa92   :  { %2278 = vmatmul.mubr.msk.f32.vlgmr.msra.gmra.mrb[10].mxu1 %vm169_vm1, %v3084_v17 }
 0xa93   :  { %2394 = vmatpush3.bf16.msra.mxu1 %v2391_v25 }
 0xb05   :  { %v1532_v0 = vpop.xlane.xlu0 %1531 }
 0xb06   :  { %v1538_v1 = vmul.f32 0.02173913, %v1532_v0 }
 0xb08   :  { %v1542_v2 = vadd.f32 1e-05, %v1538_v1 }
 0xb09   :  { %v1535_v3 = vpop.xlane.xlu1 %1534 }
 0xb0a   :  { %2460 = vrsqrt.f32 %v1542_v2  ;;  %v1539_v4 = vmul.f32 0.02173913, %v1535_v3 }
 0xb0c   :  { %v1543_v5 = vadd.f32 1e-05, %v1539_v4 }
 0xb0e   :  { %2462 = vrsqrt.f32 %v1543_v5 }
 0xb14   :  { %v2461_v6 = vpop.eup %2460 }
 0xb15   :  { %v1550_v50 = vmul.f32 %v2461_v6, %v1518_v27  ;;  %v1799_v27 = vld [vmem:[#allocation14 + $0x18] sm:$0xff] }
 0xb16   :  { %v2395_v29 = vpack.c.bf16 %v1799_v27, %v1798_v23 }
 0xb17   :  { %v1558_v7 = vmul.f32 %v1555_v45, %v1550_v50 }
 0xb18   :  { %v2463_v8 = vpop.eup %2462  ;;  %2396 = vmatprep.subr.bf16.mxu1 %v2395_v29 }
 0xb19   :  { %v3092_v35 = vadd.f32 %v1563_v51, %v1558_v7  ;;  %v1551_v9 = vmul.f32 %v2463_v8, %v1519_v33  ;;  %2398 = vmatpush3.bf16.msra.mxu1 %v2395_v29  ;;  %v2399_v33 = vpack.c.bf16 %v1801_v32, %v1800_v31 }
 0xb1b   :  { %2280 = vmatprep.mubr.msk.f32.mxu1 %vm169_vm1, %v3092_v35  ;;  %v1559_v10 = vmul.f32 %v1555_v45, %v1551_v9  ;;  %2401 = vmatprep.subr.msk.bf16.mxu1 %vm2903_vm3, %v2399_v33 }
 0xb1d   :  { %v3096_v11 = vadd.f32 %v1563_v51, %v1559_v10  ;;  %2404 = vmatpush3.bf16.msk.msra.mxu1 %vm2903_vm3, %v2399_v33 }
 0xb1f   :  { %2281 = vmatmul.mubr.msk.f32.gmra.mrb[12].mxu1 %vm169_vm1, %v3096_v11 }
 0xb65   :  { %v2279_v13 = vpop.f32.mrb[10].mxu1 }
 0xb66   :  { %v1665_v14 = vadd.f32 %v2279_v13, %v1577_v46  ;;  %v1659_v15 = vpop.f32.mrb[11].mxu1 }
 0xb67   :  { %v1660_v47 = vadd.f32 %v1659_v15, %v1577_v46 }
 0xb68   :  { %v1679_v18 = vmax.f32 %v1665_v14, 0.0 }
 0xb69   :  { %v1678_v16 = vmax.f32 %v1660_v47, 0.0 }
 0xb6b   :  { %2295 = vmatprep.mubr.msk.f32.mxu0 %vm169_vm1, %v1678_v16 }
 0xb6c   :  { %2296 = vmatmul.mubr.msk.f32.vlgmr.msra.gmra.mrb[16].mxu0 %vm169_vm1, %v1679_v18 }
 0xbf2   :  { %v2282_v34 = vpop.f32.mrb[12].mxu1 }
 0xbf3   :  { %v1675_v36 = vadd.f32 %v2282_v34, %v1577_v46  ;;  %v1669_v37 = vpop.f32.mrb[13].mxu1 }
 0xbf4   :  { %v1670_v38 = vadd.f32 %v1669_v37, %v1577_v46 }
 0xbf5   :  { %v1681_v40 = vmax.f32 %v1675_v36, 0.0 }
 0xbf6   :  { %v1680_v39 = vmax.f32 %v1670_v38, 0.0 }
 0xbf8   :  { %2298 = vmatprep.mubr.msk.f32.mxu0 %vm169_vm1, %v1680_v39 }
 0xbf9   :  { %2299 = vmatmul.mubr.msk.f32.gmra.mrb[18].mxu0 %vm169_vm1, %v1681_v40 }
 0xc3f   :  { %v2297_v43 = vpop.f32.mrb[16].mxu0 }
 0xc40   :  { %v1779_v44 = vadd.f32 %v2297_v43, %v1691_v42  ;;  %v1773_v28 = vpop.f32.mrb[17].mxu0 }
 0xc41   :  { %v1774_v45 = vadd.f32 %v1773_v28, %v1691_v42  ;;  %v2063_v28 = vld [vmem:[%s3163_s9 + $0x8] ss:$0 sm:$0xff]  ;;  %s2696_s9 = smov [#allocation16]  }
 0xc42   :  { %v1793_v48 = vmax.f32 %v1779_v44, 0.0  ;;  %s1991_s16 = sshll.u32 %s2696_s9, 4  ;;  %s1992_s16 = int_to_ptr.vmem [resolvable:$true] %s1991_s16 }
 0xc43   :  { %v1792_v19 = vmax.f32 %v1774_v45, 0.0  ;;  %s2648_s12 = scalar_lea.vmem %s1992_s16, 512  ;;  %p2653_p9 = scmp.lt.s32.totalorder %s1992_s16, %s1992_s16 }
 0xc44   :  { %p2649_p8 = scmp.ne.s32.totalorder %s1992_s16, %s2648_s12  ;;  %p2654_p10 = scmp.lt.s32.totalorder %s2648_s12, %s2648_s12 }
 0xc45   :  { %2313 = vmatprep.mubr.msk.f32.mxu1 %vm169_vm1, %v1792_v19 }
 0xc46   :  { %2314 = vmatmul.mubr.msk.f32.vlgmr.msra.gmra.mrb[14].mxu1 %vm169_vm1, %v1793_v48  ;;  %p2655_p11 = por %p2654_p10, %p2653_p9 }
 0xc48   :  { %p2656_p12 = pnand %p2655_p11, %p2649_p8 }
 0xccc   :  { %v2300_v49 = vpop.f32.mrb[18].mxu0 }
 0xccd   :  { %v1789_v51 = vadd.f32 %v2300_v49, %v1691_v42  ;;  %v1783_v52 = vpop.f32.mrb[19].mxu0 }
 0xcce   :  { %v1784_v53 = vadd.f32 %v1783_v52, %v1691_v42  ;;  %v1969_v42 = vrot.slane %v2929_v26, %v1968_v41 }
 0xccf   :  { %v1795_v56 = vmax.f32 %v1789_v51, 0.0 }
 0xcd0   :  { %v1794_v54 = vmax.f32 %v1784_v53, 0.0 }
 0xcd2   :  { %2316 = vmatprep.mubr.msk.f32.mxu1 %vm169_vm1, %v1794_v54 }
 0xcd3   :  { %2317 = vmatmul.mubr.msk.f32.gmra.mrb[16].mxu1 %vm169_vm1, %v1795_v56 }
 0xd19   :  { %v2315_v59 = vpop.f32.mrb[14].mxu1 }
 0xd1a   :  { %v1893_v60 = vadd.f32 %v2315_v59, %v1805_v58  ;;  %v1887_v22 = vpop.f32.mrb[15].mxu1 }
 0xd1b   :  { %v1888_v61 = vadd.f32 %v1887_v22, %v1805_v58 }
 0xd1c   :  { %v1907_v30 = vmax.f32 %v1893_v60, 0.0 }
 0xd1d   :  { %v1906_v62 = vmax.f32 %v1888_v61, 0.0 }
 0xd1e   :  { %v1911_v63 = vadd.f32 %v1907_v30, %v3084_v17 }
 0xd1f   :  { %v1910_v1 = vadd.f32 %v1906_v62, %v3080_v55 }
 0xd20   :  { %v1917_v0 = vsel %vm169_vm1, %v1911_v63, 0.0 }
 0xd21   :  { %1918 = vadd.xlane.f32.xlu1 %v1917_v0  ;;  %v1914_v2 = vsel %vm169_vm1, %v1910_v1, 0.0 }
 0xd25   :  { %1915 = vadd.xlane.f32.xlu1 %v1914_v2 }
 0xda6   :  { %v2318_v3 = vpop.f32.mrb[16].mxu1 }
 0xda7   :  { %v1903_v4 = vadd.f32 %v2318_v3, %v1805_v58  ;;  %v1897_v5 = vpop.f32.mrb[17].mxu1 }
 0xda8   :  { %v1898_v6 = vadd.f32 %v1897_v5, %v1805_v58 }
 0xda9   :  { %v1909_v50 = vmax.f32 %v1903_v4, 0.0 }
 0xdaa   :  { %v1908_v7 = vmax.f32 %v1898_v6, 0.0 }
 0xdab   :  { %v1913_v17 = vadd.f32 %v1909_v50, %v3096_v11 }
 0xdac   :  { %v1912_v8 = vadd.f32 %v1908_v7, %v3092_v35 }
 0xdad   :  { %v1923_v46 = vsel %vm169_vm1, %v1913_v17, 0.0 }
 0xdae   :  { %v1919_v9 = vpop.xlane.xlu1 %1918  ;;  %v1920_v10 = vsel %vm169_vm1, %v1912_v8, 0.0 }
 0xdaf   :  { %1921 = vadd.xlane.f32.xlu1 %v1920_v10  ;;  %v1927_v12 = vmul.f32 0.02173913, %v1919_v9 }
 0xdb1   :  { %v1931_v14 = vsub.f32 %v1911_v63, %v1927_v12 }
 0xdb2   :  { %v1916_v55 = vpop.xlane.xlu1 %1915 }
 0xdb3   :  { %v1926_v13 = vmul.f32 0.02173913, %v1916_v55  ;;  %1924 = vadd.xlane.f32.xlu1 %v1923_v46  ;;  %v1935_v18 = vmul.f32 %v1931_v14, %v1931_v14 }
 0xdb5   :  { %v1930_v15 = vsub.f32 %v1910_v1, %v1926_v13  ;;  %v1941_v35 = vsel %vm169_vm1, %v1935_v18, 0.0 }
 0xdb7   :  { %v1934_v47 = vmul.f32 %v1930_v15, %v1930_v15 }
 0xdb9   :  { %v1938_v16 = vsel %vm169_vm1, %v1934_v47, 0.0 }
 0xdba   :  { %1939 = vadd.xlane.f32.xlu1 %v1938_v16 }
 0xdbe   :  { %1942 = vadd.xlane.f32.xlu1 %v1941_v35 }
 0xe3c   :  { %v1922_v20 = vpop.xlane.xlu1 %1921 }
 0xe3d   :  { %v1928_v21 = vmul.f32 0.02173913, %v1922_v20 }
 0xe3f   :  { %v1932_v11 = vsub.f32 %v1912_v8, %v1928_v21 }
 0xe40   :  { %v1925_v23 = vpop.xlane.xlu1 %1924 }
 0xe41   :  { %v1929_v25 = vmul.f32 0.02173913, %v1925_v23  ;;  %v1936_v27 = vmul.f32 %v1932_v11, %v1932_v11 }
 0xe43   :  { %v1933_v29 = vsub.f32 %v1913_v17, %v1929_v25  ;;  %v1944_v31 = vsel %vm169_vm1, %v1936_v27, 0.0 }
 0xe44   :  { %1945 = vadd.xlane.f32.xlu0 %v1944_v31 }
 0xe45   :  { %v1937_v32 = vmul.f32 %v1933_v29, %v1933_v29 }
 0xe47   :  { %v1940_v33 = vpop.xlane.xlu1 %1939  ;;  %v1947_v34 = vsel %vm169_vm1, %v1937_v32, 0.0 }
 0xe48   :  { %v1950_v36 = vmul.f32 0.02173913, %v1940_v33  ;;  %1948 = vadd.xlane.f32.xlu1 %v1947_v34 }
 0xe4a   :  { %v1954_v37 = vadd.f32 1e-05, %v1950_v36 }
 0xe4b   :  { %v1943_v38 = vpop.xlane.xlu1 %1942 }
 0xe4c   :  { %2464 = vrsqrt.f32 %v1954_v37  ;;  %v1951_v39 = vmul.f32 0.02173913, %v1943_v38 }
 0xe4e   :  { %v1955_v40 = vadd.f32 1e-05, %v1951_v39 }
 0xe50   :  { %2466 = vrsqrt.f32 %v1955_v40 }
 0xe56   :  { %v2465_v43 = vpop.eup %2464 }
 0xe57   :  { %v1962_v44 = vmul.f32 %v2465_v43, %v1930_v15 }
 0xe59   :  { %v1970_v45 = vmul.f32 %v1969_v42, %v1962_v44 }
 0xe5a   :  { %v2467_v19 = vpop.eup %2466 }
 0xe5b   :  { %v1963_v48 = vmul.f32 %v2467_v19, %v1931_v14  ;;  %v1978_v49 = vadd.f32 %v2063_v28, %v1970_v45 }
 0xe5d   :  { %v1971_v51 = vmul.f32 %v1969_v42, %v1963_v48  ;;  %1982 = vst.msk [vmem:[#allocation16] sm:$0xff] %vm169_vm1, %v1978_v49 }
 0xe5f   :  { %v1979_v52 = vadd.f32 %v2063_v28, %v1971_v51 }
 0xe61   :  { %1983 = vst.msk [vmem:[#allocation16 + $0x8] sm:$0xff] %vm169_vm1, %v1979_v52 }
 0xed1   :  { %v1946_v53 = vpop.xlane.xlu0 %1945 }
 0xed2   :  { %v1952_v24 = vmul.f32 0.02173913, %v1946_v53 }
 0xed4   :  { %v1956_v54 = vadd.f32 1e-05, %v1952_v24 }
 0xed5   :  { %v1949_v26 = vpop.xlane.xlu1 %1948 }
 0xed6   :  { %2468 = vrsqrt.f32 %v1956_v54  ;;  %v1953_v56 = vmul.f32 0.02173913, %v1949_v26 }
 0xed8   :  { %v1957_v57 = vadd.f32 1e-05, %v1953_v56 }
 0xeda   :  { %2470 = vrsqrt.f32 %v1957_v57 }
 0xee0   :  { %v2469_v58 = vpop.eup %2468 }
 0xee1   :  { %v1964_v59 = vmul.f32 %v2469_v58, %v1932_v11 }
 0xee3   :  { %v1972_v60 = vmul.f32 %v1969_v42, %v1964_v59 }
 0xee4   :  { %v2471_v22 = vpop.eup %2470 }
 0xee5   :  { %v1965_v61 = vmul.f32 %v2471_v22, %v1933_v29  ;;  %v1980_v30 = vadd.f32 %v2063_v28, %v1972_v60 }
 0xee7   :  { %v1973_v62 = vmul.f32 %v1969_v42, %v1965_v61  ;;  %1984 = vst.msk [vmem:[#allocation16 + $0x10] sm:$0xff] %vm169_vm1, %v1980_v30 }
 0xee9   :  { %v1981_v63 = vadd.f32 %v2063_v28, %v1973_v62 }
 0xeeb   :  { %1985 = vst.msk [vmem:[#allocation16 + $0x18] sm:$0xff] %vm169_vm1, %v1981_v63 }
 0xeec   :  { %2659 = shalt.err (!%p2656_p12)
}
 0xeed   :  { %s2660_s22 = scalar_lea.hbm %s3164_s10, 512 }
 0xeee   :  { %p2661_p13 = scmp.ne.s32.totalorder %s3164_s10, %s2660_s22  ;;  %p2664_p0 = scmp.lt.u32.totalorder %s2660_s22, %s3164_s10 }
 0xef0   :  { %p2666_p1 = pnand %p2664_p0, %p2661_p13 }
 0xef2   :  { %2669 = shalt.err (!%p2666_p1)
}
 0xef3   :  { %1997 = dma.vmem_to_hbm [thread:$0]  %s1992_s16, 512, %s3164_s10, [#allocation4], %s2684_s25, %s2684_s25, %s2685_s26  }
 0xef4   :  { %2680 = dma.done.wait [#allocation4], 512  }
 0xef5   :  { %2681 = vsyncadd [#allocation4], 4294966784 }
 0xef6   :  { %2001 = vsyncpa [#allocation3], 1 }
 0xef7   :  { %2002 = vsyncpa [#allocation6], 1 }
 0xef8   :  { %2003 = vsyncpa [#allocation9], 1 }
 0xef9   :  { %2004 = vsyncpa [#allocation12], 1 }
 0xefa   :  { %2005 = vsyncpa [#allocation15], 1 }
 0xefb   :  { %2006 = vsyncpa [#allocation4], 1 }

</bundles_post_ra>
